<compile_context>
chip_gen: v5e
topology: v5e:2x2
jax: 0.10.0
libtpu: 0.0.40
codegen_flags: <defaults>
</compile_context>

<pallas_src>
import functools

import jax
import jax.numpy as jnp
from jax.experimental import pallas as pl
from jax.experimental.pallas import tpu as pltpu

LANE = 128      # TPU vreg lane width
SUBLANE = 8     # TPU vreg sublane count (f32)


def _round_up(x, m):
    return ((x + m - 1) // m) * m


def _pick_time_chunk(seq_len, target=64):
    """Largest divisor of seq_len that is <= target (bounds per-chunk VMEM)."""
    for c in range(min(seq_len, target), 0, -1):
        if seq_len % c == 0:
            return c
    return seq_len


# --------------------------------------------------------------------------
# Fused kernel: all LSTM layers + (folded) BatchNorm + Linear + softmax.
# Grid = time chunks ("arbitrary"); h/c states persist in scratch across chunks.
# --------------------------------------------------------------------------
def _make_fused_kernel(*, num_layers, chunk_len, b_pad, h_real, s_pad, g_pad,
                       o_real, o_pad):
    unroll = max(1, min(chunk_len, 8))   # bounded unroll: no vreg-spill blowup

    def kernel(*refs):
        x_ref = refs[0]                                  # (chunk*B_pad, Din)
        layer_refs = refs[1:1 + 3 * num_layers]          # (w_ih, w_hh, bias) per layer
        fcw_ref = refs[1 + 3 * num_layers]               # (s_pad, O_pad)  BN-folded
        fcb_ref = refs[2 + 3 * num_layers]               # (1, O_pad)      BN-folded
        out_ref = refs[3 + 3 * num_layers]               # (B_pad, O_pad)
        xproj_scr, hseq_scr, h_all, c_all = refs[4 + 3 * num_layers:]

        chunk = pl.program_id(0)

        @pl.when(chunk == 0)
        def _init():
            h_all[...] = jnp.zeros_like(h_all)
            c_all[...] = jnp.zeros_like(c_all)

        # Hoisted lane masks / constants (never rebuilt inside the serial loop).
        gl = jax.lax.broadcasted_iota(jnp.int32, (b_pad, g_pad), 1)
        g_blk = jnp.logical_and(gl >= 2 * h_real, gl < 3 * h_real)   # tanh-gate lanes
        # sigmoid(x) = 0.5*tanh(0.5*x) + 0.5  ->  one tanh pass over the packed
        # gate tile; per-lane pre-scale / post-offset select sigmoid vs tanh.
        pre_scale = jnp.where(g_blk, 1.0, 0.5).astype(jnp.float32)
        post_off = jnp.where(g_blk, 0.0, 0.5).astype(jnp.float32)
        sl = jax.lax.broadcasted_iota(jnp.int32, (b_pad, s_pad), 1)
        live = (sl < h_real).astype(jnp.float32)          # keep padded state lanes 0

        def take_state(a):
            return a if g_pad == s_pad else a[:, :s_pad]

        def aligned_gate(act, k):
            # Bring gate k (lanes [k*H, (k+1)*H)) down to lanes [0, H) via the
            # XLU (cheap; EUP/VPU are the binding slots in the serial loop).
            if k == 0:
                return take_state(act)
            return take_state(pltpu.roll(act, g_pad - k * h_real, 1))

        for layer in range(num_layers):
            w_ih = layer_refs[3 * layer][...]       # (Din or s_pad, g_pad)
            w_hh = layer_refs[3 * layer + 1][...]   # (s_pad, g_pad)
            bias = layer_refs[3 * layer + 2][...]   # (1, g_pad), f32

            # Input projection for the WHOLE chunk: one MXU pass, hoisted out
            # of the serial recurrence (stays in VMEM).
            inp = x_ref[...] if layer == 0 else hseq_scr[...]
            xproj_scr[...] = (
                jnp.dot(inp.astype(w_ih.dtype), w_ih,
                        preferred_element_type=jnp.float32) + bias)

            write_seq = layer < num_layers - 1      # last layer: only h_T needed

            def step(t, carry, layer=layer, w_hh=w_hh, write_seq=write_seq):
                row = pl.multiple_of(t * b_pad, b_pad)
                h_prev = h_all[layer]                               # (B_pad, s_pad)
                gates = xproj_scr[pl.ds(row, b_pad), :] + jnp.dot(
                    h_prev.astype(w_hh.dtype), w_hh,
                    preferred_element_type=jnp.float32)             # (B_pad, g_pad)

                # Single tanh over the packed gate tile (EUP), then per-lane
                # affine to recover sigmoid(i/f/o) and tanh(g).
                th = jnp.tanh(gates * pre_scale)
                act = th * pre_scale + post_off

                i_g = aligned_gate(act, 0)
                f_g = aligned_gate(act, 1)
                g_g = aligned_gate(act, 2)
                o_g = aligned_gate(act, 3)

                c_new = f_g * c_all[layer] + i_g * g_g
                h_new = o_g * jnp.tanh(c_new)
                # Mask rolled-in junk so padded state lanes stay exactly zero.
                c_all[layer] = c_new * live
                h_new = h_new * live
                h_all[layer] = h_new
                if write_seq:                       # feeds next layer, VMEM-resident
                    hseq_scr[pl.ds(row, b_pad), :] = h_new
                return carry

            jax.lax.fori_loop(0, chunk_len, step, 0, unroll=unroll)

        # ---- head (last chunk only): folded BatchNorm + Linear + softmax ----
        @pl.when(chunk == pl.num_programs(0) - 1)
        def _head():
            fcw = fcw_ref[...]
            h_last = h_all[num_layers - 1]                           # (B_pad, s_pad)
            logits = (jnp.dot(h_last.astype(fcw.dtype), fcw,
                              preferred_element_type=jnp.float32)
                      + fcb_ref[...])                                # (B_pad, O_pad)
            col = jax.lax.broadcasted_iota(jnp.int32, (b_pad, o_pad), 1)
            logits = jnp.where(col < o_real, logits, -1e30)          # mask padded lanes
            m = jnp.max(logits, axis=1, keepdims=True)
            e = jnp.exp(logits - m)
            s = jnp.sum(e, axis=1, keepdims=True)
            inv = pl.reciprocal(s, approx=True)
            inv = inv * (2.0 - s * inv)            # one Newton step -> ~f32 exact
            out_ref[...] = e * inv                 # single lane-dense store

    return kernel


# --------------------------------------------------------------------------
# Forward wrapper: one fused pallas_call with a time-chunk grid.
# --------------------------------------------------------------------------
@functools.partial(jax.jit, static_argnames=("o_real", "h_real"))
def advanced_lstm_forward(packed, origin_data, *, o_real, h_real):
    """origin_data: (B, T, input_size), batch_first like the PyTorch module."""
    x = origin_data.astype(jnp.float32)
    B, T, D = x.shape
    # NOTE: larger batches are nearly free per-step MXU throughput (rows up to
    # the MXU tile height); pad/stack batches toward 128/256 where possible.
    b_pad = _round_up(B, SUBLANE)
    lstm = packed["lstm"]
    num_layers = len(lstm)
    s_pad = lstm[0]["w_hh"].shape[0]     # state lane width  (round_up(H, 128))
    g_pad = lstm[0]["w_hh"].shape[1]     # packed gate width (round_up(4H, 128))
    o_pad = packed["fc_w"].shape[1]

    chunk_len = _pick_time_chunk(T)
    num_chunks = T // chunk_len

    # Time-major, batch-padded, flattened to (T*B_pad, D); chunked by BlockSpec.
    x = jnp.transpose(x, (1, 0, 2))
    x = jnp.pad(x, ((0, 0), (0, b_pad - B), (0, 0)))
    x = x.reshape(T * b_pad, D)

    operands = [x]
    for lyr in lstm:
        operands += [lyr["w_ih"], lyr["w_hh"], lyr["bias"]]
    operands += [packed["fc_w"], packed["fc_b"]]

    kernel = _make_fused_kernel(
        num_layers=num_layers, chunk_len=chunk_len, b_pad=b_pad,
        h_real=h_real, s_pad=s_pad, g_pad=g_pad, o_real=o_real, o_pad=o_pad)

    # x is walked chunk-by-chunk (double-buffered DMA); weights are small and
    # stay fully VMEM-resident (for large H / many layers, move them to
    # memory_space=pl.ANY and prefetch layer k+1 during layer k's recurrence).
    in_specs = [pl.BlockSpec((chunk_len * b_pad, D), lambda c: (c, 0))]
    in_specs += [pl.BlockSpec(op.shape, lambda c: (0, 0)) for op in operands[1:]]

    out = pl.pallas_call(
        kernel,
        out_shape=jax.ShapeDtypeStruct((b_pad, o_pad), jnp.float32),
        grid=(num_chunks,),
        in_specs=in_specs,
        out_specs=pl.BlockSpec((b_pad, o_pad), lambda c: (0, 0)),
        scratch_shapes=[
            pltpu.VMEM((chunk_len * b_pad, g_pad), jnp.float32),   # xproj (per chunk)
            pltpu.VMEM((chunk_len * b_pad, s_pad), jnp.float32),   # inter-layer hidden chunk
            pltpu.VMEM((num_layers, b_pad, s_pad), jnp.float32),   # h, carried across chunks
            pltpu.VMEM((num_layers, b_pad, s_pad), jnp.float32),   # c, carried across chunks
        ],
        compiler_params=pltpu.CompilerParams(
            dimension_semantics=("arbitrary",),      # serial recurrence over chunks
            vmem_limit_bytes=32 * 1024 * 1024),      # bounded by chunking (v7x-safe)
    )(*operands)
    return out[:B, :o_real]


# --------------------------------------------------------------------------
# Parameter init (deterministic, mirrors PyTorch default inits; weights are
# stored transposed vs. PyTorch, i.e. (in_features, out_features)).
# --------------------------------------------------------------------------
def init_params(key, input_size, hidden_size, output_size, num_layer):
    params = {"lstm": []}
    k_lstm = 1.0 / jnp.sqrt(hidden_size)
    for layer in range(num_layer):
        din = input_size if layer == 0 else hidden_size
        key, k1, k2, k3, k4 = jax.random.split(key, 5)
        w_ih = jax.random.uniform(k1, (din, 4 * hidden_size),
                                  minval=-k_lstm, maxval=k_lstm, dtype=jnp.float32)
        w_hh = jax.random.uniform(k2, (hidden_size, 4 * hidden_size),
                                  minval=-k_lstm, maxval=k_lstm, dtype=jnp.float32)
        b_ih = jax.random.uniform(k3, (4 * hidden_size,),
                                  minval=-k_lstm, maxval=k_lstm, dtype=jnp.float32)
        b_hh = jax.random.uniform(k4, (4 * hidden_size,),
                                  minval=-k_lstm, maxval=k_lstm, dtype=jnp.float32)
        params["lstm"].append({
            "w_ih": w_ih, "w_hh": w_hh,
            "bias": (b_ih + b_hh).reshape(1, 4 * hidden_size),
        })
    # BatchNorm1d (running stats at init) + Linear classifier.
    params["bn_gamma"] = jnp.ones((1, hidden_size), jnp.float32)
    params["bn_beta"] = jnp.zeros((1, hidden_size), jnp.float32)
    params["bn_mean"] = jnp.zeros((1, hidden_size), jnp.float32)
    params["bn_var"] = jnp.ones((1, hidden_size), jnp.float32)
    key, k5, k6 = jax.random.split(key, 3)
    k_fc = 1.0 / jnp.sqrt(hidden_size)
    params["fc_w"] = jax.random.uniform(k5, (hidden_size, output_size),
                                        minval=-k_fc, maxval=k_fc, dtype=jnp.float32)
    params["fc_b"] = jax.random.uniform(k6, (1, output_size),
                                        minval=-k_fc, maxval=k_fc, dtype=jnp.float32)
    return params


# --------------------------------------------------------------------------
# One-time packing: packed-gate lane layout (4H lanes, zero-padded to tiles)
# + fold eval-mode BatchNorm into the classifier.  `compute_dtype=bfloat16`
# casts the MXU weight operands (biases / gate math / softmax stay f32).
# --------------------------------------------------------------------------
def pack_params(params, *, eps=1e-5, compute_dtype=jnp.float32):
    H = params["bn_gamma"].shape[-1]
    s_pad = _round_up(H, LANE)          # state lane width (only lanes < H live)
    g_pad = _round_up(4 * H, LANE)      # packed gates [i|f|g|o], contiguous
    packed = {"lstm": []}
    for idx, lyr in enumerate(params["lstm"]):
        w_ih = jnp.pad(lyr["w_ih"], ((0, 0), (0, g_pad - 4 * H)))
        if idx > 0:      # layers >= 1 consume the lane-padded hidden state
            w_ih = jnp.pad(w_ih, ((0, s_pad - H), (0, 0)))
        w_hh = jnp.pad(lyr["w_hh"], ((0, s_pad - H), (0, g_pad - 4 * H)))
        bias = jnp.pad(lyr["bias"], ((0, 0), (0, g_pad - 4 * H)))
        # Zero padding is load-bearing: padded weight rows/cols must stay zero
        # so dead state lanes never leak into live gates.
        packed["lstm"].append({
            "w_ih": w_ih.astype(compute_dtype),
            "w_hh": w_hh.astype(compute_dtype),
            "bias": bias,                       # f32, added post-MXU
        })

    # eval-mode BatchNorm1d(h) = h*scale + shift  ->  fold into the Linear.
    scale = params["bn_gamma"] * jax.lax.rsqrt(params["bn_var"] + eps)   # (1,H)
    shift = params["bn_beta"] - params["bn_mean"] * scale                # (1,H)
    eff_w = params["fc_w"] * scale.reshape(-1, 1)                        # (H,O)
    eff_b = params["fc_b"] + shift @ params["fc_w"]                      # (1,O)
    O = eff_w.shape[1]
    o_pad = _round_up(O, LANE)
    packed["fc_w"] = jnp.pad(eff_w, ((0, s_pad - H), (0, o_pad - O))).astype(compute_dtype)
    packed["fc_b"] = jnp.pad(eff_b, ((0, 0), (0, o_pad - O)))
    return packed


# --------------------------------------------------------------------------
# Pure-JAX reference (eval mode), mirrors the PyTorch module.
# --------------------------------------------------------------------------
def reference_forward(params, origin_data, eps=1e-5):
    hp = jax.lax.Precision.HIGHEST
    H = params["bn_gamma"].shape[-1]
    seq = jnp.transpose(origin_data.astype(jnp.float32), (1, 0, 2))  # (T,B,D)
    T, B, _ = seq.shape
    for lyr in params["lstm"]:
        h = jnp.zeros((B, H), jnp.float32)
        c = jnp.zeros((B, H), jnp.float32)
        outs = []
        for t in range(T):
            gates = (jnp.dot(seq[t], lyr["w_ih"], precision=hp)
                     + jnp.dot(h, lyr["w_hh"], precision=hp) + lyr["bias"])
            i = jax.nn.sigmoid(gates[:, 0 * H:1 * H])
            f = jax.nn.sigmoid(gates[:, 1 * H:2 * H])
            g = jnp.tanh(gates[:, 2 * H:3 * H])
            o = jax.nn.sigmoid(gates[:, 3 * H:4 * H])
            c = f * c + i * g
            h = o * jnp.tanh(c)
            outs.append(h)
        seq = jnp.stack(outs, axis=0)
    last = seq[-1]
    xn = ((last - params["bn_mean"]) * jax.lax.rsqrt(params["bn_var"] + eps)
          * params["bn_gamma"] + params["bn_beta"])
    logits = jnp.dot(xn, params["fc_w"], precision=hp) + params["fc_b"]
    return jax.nn.softmax(logits, axis=1)


if __name__ == "__main__":
    B, T, INPUT, HIDDEN, OUTPUT, LAYERS = 2, 8, 16, 32, 4, 2

    key = jax.random.PRNGKey(0)
    k_param, k_x = jax.random.split(key)
    params = init_params(k_param, INPUT, HIDDEN, OUTPUT, LAYERS)
    x = jax.random.normal(k_x, (B, T, INPUT), dtype=jnp.float32)
    ref = reference_forward(params, x)

    # --- f32 weights: tight correctness check against the PyTorch-style ref ---
    packed = pack_params(params)                      # one-time pack + BN fold
    probs = advanced_lstm_forward(packed, x, o_real=OUTPUT, h_real=HIDDEN)
    probs = jax.block_until_ready(probs)
    assert probs.shape == (B, OUTPUT)
    assert bool(jnp.all(jnp.isfinite(probs)))
    assert bool(jnp.allclose(jnp.sum(probs, axis=1), 1.0, atol=1e-4))
    max_err = float(jnp.max(jnp.abs(probs - ref)))
    assert max_err < 2e-3, f"f32 mismatch vs pure-JAX reference: {max_err}"

    # --- bf16 weights for the MXU (review item): looser tolerance since bf16
    #     rounding compounds through the T-step recurrence; gate/softmax math
    #     stays f32 inside the kernel. ---
    packed_bf16 = pack_params(params, compute_dtype=jnp.bfloat16)
    probs_bf16 = jax.block_until_ready(
        advanced_lstm_forward(packed_bf16, x, o_real=OUTPUT, h_real=HIDDEN))
    assert bool(jnp.all(jnp.isfinite(probs_bf16)))
    assert bool(jnp.allclose(jnp.sum(probs_bf16, axis=1), 1.0, atol=1e-3))
    max_err_bf16 = float(jnp.max(jnp.abs(probs_bf16 - ref)))
    assert max_err_bf16 < 3e-2, f"bf16 mismatch vs reference: {max_err_bf16}"

    print("KERNEL_OK")
</pallas_src>

<mosaic_0001>
module attributes {stable_mosaic.version = 11 : i64} {
  func.func @kernel(%arg0: i32, %arg1: memref<64x16xf32, #tpu.memory_space<vmem>>, %arg2: memref<16x128xf32, #tpu.memory_space<vmem>>, %arg3: memref<128x128xf32, #tpu.memory_space<vmem>>, %arg4: memref<1x128xf32, #tpu.memory_space<vmem>>, %arg5: memref<128x128xf32, #tpu.memory_space<vmem>>, %arg6: memref<128x128xf32, #tpu.memory_space<vmem>>, %arg7: memref<1x128xf32, #tpu.memory_space<vmem>>, %arg8: memref<128x128xf32, #tpu.memory_space<vmem>>, %arg9: memref<1x128xf32, #tpu.memory_space<vmem>>, %arg10: memref<8x128xf32, #tpu.memory_space<vmem>>, %arg11: memref<64x128xf32, #tpu.memory_space<vmem>>, %arg12: memref<64x128xf32, #tpu.memory_space<vmem>>, %arg13: memref<2x8x128xf32, #tpu.memory_space<vmem>>, %arg14: memref<2x8x128xf32, #tpu.memory_space<vmem>>) attributes {dimension_semantics = [#tpu.dimension_semantics<arbitrary>], iteration_bounds = array<i64: 1>, scalar_prefetch = 0 : i64, scratch_operands = 4 : i64, tpu.core_type = #tpu.core_type<tc>, window_params = [{transform_indices = @transform_0, window_bounds = array<i64: 64, 16>}, {pipeline_mode = #tpu.pipeline_mode<synchronous>, transform_indices = @transform_1, window_bounds = array<i64: 16, 128>}, {pipeline_mode = #tpu.pipeline_mode<synchronous>, transform_indices = @transform_2, window_bounds = array<i64: 128, 128>}, {pipeline_mode = #tpu.pipeline_mode<synchronous>, transform_indices = @transform_3, window_bounds = array<i64: 1, 128>}, {pipeline_mode = #tpu.pipeline_mode<synchronous>, transform_indices = @transform_4, window_bounds = array<i64: 128, 128>}, {pipeline_mode = #tpu.pipeline_mode<synchronous>, transform_indices = @transform_5, window_bounds = array<i64: 128, 128>}, {pipeline_mode = #tpu.pipeline_mode<synchronous>, transform_indices = @transform_6, window_bounds = array<i64: 1, 128>}, {pipeline_mode = #tpu.pipeline_mode<synchronous>, transform_indices = @transform_7, window_bounds = array<i64: 128, 128>}, {pipeline_mode = #tpu.pipeline_mode<synchronous>, transform_indices = @transform_8, window_bounds = array<i64: 1, 128>}, {pipeline_mode = #tpu.pipeline_mode<synchronous>, transform_indices = @transform_9, window_bounds = array<i64: 8, 128>}]} {
    %c0_i32 = arith.constant 0 : i32
    %0 = arith.cmpi eq, %arg0, %c0_i32 : i32
    %1 = arith.extui %0 : i1 to i32
    %c0_i32_0 = arith.constant 0 : i32
    %2 = arith.cmpi ne, %1, %c0_i32_0 : i32
    scf.if %2 {
      %cst_332 = arith.constant 0.000000e+00 : f32
      %535 = vector.broadcast %cst_332 : f32 to vector<2x8x128xf32>
      %c0_333 = arith.constant 0 : index
      %c0_334 = arith.constant 0 : index
      %c0_335 = arith.constant 0 : index
      %536 = vector.load %arg13[%c0_333, %c0_334, %c0_335] : memref<2x8x128xf32, #tpu.memory_space<vmem>>, vector<2x8x128xf32>
      tpu.vector_store %arg13[%c0_333, %c0_334, %c0_335], %535 {strides = array<i32>} : memref<2x8x128xf32, #tpu.memory_space<vmem>>, vector<2x8x128xf32>,
      %cst_336 = arith.constant 0.000000e+00 : f32
      %537 = vector.broadcast %cst_336 : f32 to vector<2x8x128xf32>
      %c0_337 = arith.constant 0 : index
      %c0_338 = arith.constant 0 : index
      %c0_339 = arith.constant 0 : index
      %538 = vector.load %arg14[%c0_337, %c0_338, %c0_339] : memref<2x8x128xf32, #tpu.memory_space<vmem>>, vector<2x8x128xf32>
      tpu.vector_store %arg14[%c0_337, %c0_338, %c0_339], %537 {strides = array<i32>} : memref<2x8x128xf32, #tpu.memory_space<vmem>>, vector<2x8x128xf32>,
    } else {
    }
    %3 = tpu.iota {dimensions = array<i32: 1>} : vector<8x128xi32>
    %c64_i32 = arith.constant 64 : i32
    %4 = vector.broadcast %c64_i32 : i32 to vector<8x128xi32>
    %5 = arith.cmpi sge, %3, %4 : vector<8x128xi32>
    %c96_i32 = arith.constant 96 : i32
    %6 = vector.broadcast %c96_i32 : i32 to vector<8x128xi32>
    %7 = arith.cmpi slt, %3, %6 : vector<8x128xi32>
    %8 = arith.andi %5, %7 : vector<8x128xi1>
    %cst = arith.constant 1.000000e+00 : f32
    %cst_1 = arith.constant 5.000000e-01 : f32
    %9 = vector.broadcast %cst : f32 to vector<8x128xf32>
    %10 = vector.broadcast %cst_1 : f32 to vector<8x128xf32>
    %11 = arith.select %8, %9, %10 : vector<8x128xi1>, vector<8x128xf32>
    %cst_2 = arith.constant 0.000000e+00 : f32
    %cst_3 = arith.constant 5.000000e-01 : f32
    %12 = vector.broadcast %cst_2 : f32 to vector<8x128xf32>
    %13 = vector.broadcast %cst_3 : f32 to vector<8x128xf32>
    %14 = arith.select %8, %12, %13 : vector<8x128xi1>, vector<8x128xf32>
    %15 = tpu.iota {dimensions = array<i32: 1>} : vector<8x128xi32>
    %c32_i32 = arith.constant 32 : i32
    %16 = vector.broadcast %c32_i32 : i32 to vector<8x128xi32>
    %17 = arith.cmpi slt, %15, %16 : vector<8x128xi32>
    %18 = arith.extui %17 : vector<8x128xi1> to vector<8x128xi32>
    %19 = arith.sitofp %18 : vector<8x128xi32> to vector<8x128xf32>
    %c0 = arith.constant 0 : index
    %c0_4 = arith.constant 0 : index
    %20 = vector.load %arg2[%c0, %c0_4] : memref<16x128xf32, #tpu.memory_space<vmem>>, vector<16x128xf32>
    %c0_5 = arith.constant 0 : index
    %c0_6 = arith.constant 0 : index
    %21 = vector.load %arg3[%c0_5, %c0_6] : memref<128x128xf32, #tpu.memory_space<vmem>>, vector<128x128xf32>
    %c0_7 = arith.constant 0 : index
    %c0_8 = arith.constant 0 : index
    %22 = vector.load %arg4[%c0_7, %c0_8] : memref<1x128xf32, #tpu.memory_space<vmem>>, vector<1x128xf32>
    %c0_9 = arith.constant 0 : index
    %c0_10 = arith.constant 0 : index
    %23 = vector.load %arg1[%c0_9, %c0_10] : memref<64x16xf32, #tpu.memory_space<vmem>>, vector<64x16xf32>
    %cst_11 = arith.constant dense<0.000000e+00> : vector<64x128xf32>
    %24 = tpu.matmul %23, %20, %cst_11 {dimension_numbers = #tpu.dot_dimension_numbers<[1], [0], [0], [1], [0, 0, 1, 1], [], []>} : vector<64x16xf32>, vector<16x128xf32>, vector<64x128xf32> -> vector<64x128xf32>
    %25 = vector.broadcast %22 : vector<1x128xf32> to vector<64x128xf32>
    %26 = arith.addf %24, %25 : vector<64x128xf32>
    %c0_12 = arith.constant 0 : index
    %c0_13 = arith.constant 0 : index
    %27 = vector.load %arg11[%c0_12, %c0_13] : memref<64x128xf32, #tpu.memory_space<vmem>>, vector<64x128xf32>
    tpu.vector_store %arg11[%c0_12, %c0_13], %26 {strides = array<i32>} : memref<64x128xf32, #tpu.memory_space<vmem>>, vector<64x128xf32>,
    %c0_i32_14 = arith.constant 0 : i32
    %c8_i32 = arith.constant 8 : i32
    %28 = arith.muli %c0_i32_14, %c8_i32 : i32
    %29 = tpu.assume_multiple %28, 8 : i32
    %c0_15 = arith.constant 0 : index
    %c0_16 = arith.constant 0 : index
    %c0_17 = arith.constant 0 : index
    %30 = vector.load %arg13[%c0_15, %c0_16, %c0_17] : memref<2x8x128xf32, #tpu.memory_space<vmem>>, vector<1x8x128xf32>
    %31 = vector.shape_cast %30 : vector<1x8x128xf32> to vector<8x128xf32>
    %32 = arith.index_cast %29 : i32 to index
    %c0_18 = arith.constant 0 : index
    %33 = vector.load %arg11[%32, %c0_18] : memref<64x128xf32, #tpu.memory_space<vmem>>, vector<8x128xf32>
    %cst_19 = arith.constant dense<0.000000e+00> : vector<8x128xf32>
    %34 = tpu.matmul %31, %21, %cst_19 {dimension_numbers = #tpu.dot_dimension_numbers<[1], [0], [0], [1], [0, 0, 1, 1], [], []>} : vector<8x128xf32>, vector<128x128xf32>, vector<8x128xf32> -> vector<8x128xf32>
    %35 = arith.addf %33, %34 : vector<8x128xf32>
    %36 = arith.mulf %35, %11 : vector<8x128xf32>
    %37 = math.tanh %36 : vector<8x128xf32>
    %38 = arith.mulf %37, %11 : vector<8x128xf32>
    %39 = arith.addf %38, %14 : vector<8x128xf32>
    %c96_i32_20 = arith.constant 96 : i32
    %40 = tpu.dynamic_rotate %39 by %c96_i32_20 dim 1 : vector<8x128xf32>, i32 -> vector<8x128xf32>
    %c64_i32_21 = arith.constant 64 : i32
    %41 = tpu.dynamic_rotate %39 by %c64_i32_21 dim 1 : vector<8x128xf32>, i32 -> vector<8x128xf32>
    %c32_i32_22 = arith.constant 32 : i32
    %42 = tpu.dynamic_rotate %39 by %c32_i32_22 dim 1 : vector<8x128xf32>, i32 -> vector<8x128xf32>
    %c0_23 = arith.constant 0 : index
    %c0_24 = arith.constant 0 : index
    %c0_25 = arith.constant 0 : index
    %43 = vector.load %arg14[%c0_23, %c0_24, %c0_25] : memref<2x8x128xf32, #tpu.memory_space<vmem>>, vector<1x8x128xf32>
    %44 = vector.shape_cast %43 : vector<1x8x128xf32> to vector<8x128xf32>
    %45 = arith.mulf %40, %44 : vector<8x128xf32>
    %46 = arith.mulf %39, %41 : vector<8x128xf32>
    %47 = arith.addf %45, %46 : vector<8x128xf32>
    %48 = math.tanh %47 : vector<8x128xf32>
    %49 = arith.mulf %42, %48 : vector<8x128xf32>
    %50 = arith.mulf %47, %19 : vector<8x128xf32>
    %c0_26 = arith.constant 0 : index
    %c0_27 = arith.constant 0 : index
    %c0_28 = arith.constant 0 : index
    %51 = vector.load %arg14[%c0_26, %c0_27, %c0_28] : memref<2x8x128xf32, #tpu.memory_space<vmem>>, vector<1x8x128xf32>
    %52 = vector.shape_cast %51 : vector<1x8x128xf32> to vector<8x128xf32>
    %53 = vector.shape_cast %50 : vector<8x128xf32> to vector<1x8x128xf32>
    tpu.vector_store %arg14[%c0_26, %c0_27, %c0_28], %53 {strides = array<i32>} : memref<2x8x128xf32, #tpu.memory_space<vmem>>, vector<1x8x128xf32>,
    %54 = arith.mulf %49, %19 : vector<8x128xf32>
    %c0_29 = arith.constant 0 : index
    %c0_30 = arith.constant 0 : index
    %c0_31 = arith.constant 0 : index
    %55 = vector.load %arg13[%c0_29, %c0_30, %c0_31] : memref<2x8x128xf32, #tpu.memory_space<vmem>>, vector<1x8x128xf32>
    %56 = vector.shape_cast %55 : vector<1x8x128xf32> to vector<8x128xf32>
    %57 = vector.shape_cast %54 : vector<8x128xf32> to vector<1x8x128xf32>
    tpu.vector_store %arg13[%c0_29, %c0_30, %c0_31], %57 {strides = array<i32>} : memref<2x8x128xf32, #tpu.memory_space<vmem>>, vector<1x8x128xf32>,
    %58 = arith.index_cast %29 : i32 to index
    %c0_32 = arith.constant 0 : index
    %59 = vector.load %arg12[%58, %c0_32] : memref<64x128xf32, #tpu.memory_space<vmem>>, vector<8x128xf32>
    tpu.vector_store %arg12[%58, %c0_32], %54 {strides = array<i32>} : memref<64x128xf32, #tpu.memory_space<vmem>>, vector<8x128xf32>,
    %c1_i32 = arith.constant 1 : i32
    %c8_i32_33 = arith.constant 8 : i32
    %60 = arith.muli %c1_i32, %c8_i32_33 : i32
    %61 = tpu.assume_multiple %60, 8 : i32
    %c0_34 = arith.constant 0 : index
    %c0_35 = arith.constant 0 : index
    %c0_36 = arith.constant 0 : index
    %62 = vector.load %arg13[%c0_34, %c0_35, %c0_36] : memref<2x8x128xf32, #tpu.memory_space<vmem>>, vector<1x8x128xf32>
    %63 = vector.shape_cast %62 : vector<1x8x128xf32> to vector<8x128xf32>
    %64 = arith.index_cast %61 : i32 to index
    %c0_37 = arith.constant 0 : index
    %65 = vector.load %arg11[%64, %c0_37] : memref<64x128xf32, #tpu.memory_space<vmem>>, vector<8x128xf32>
    %cst_38 = arith.constant dense<0.000000e+00> : vector<8x128xf32>
    %66 = tpu.matmul %63, %21, %cst_38 {dimension_numbers = #tpu.dot_dimension_numbers<[1], [0], [0], [1], [0, 0, 1, 1], [], []>} : vector<8x128xf32>, vector<128x128xf32>, vector<8x128xf32> -> vector<8x128xf32>
    %67 = arith.addf %65, %66 : vector<8x128xf32>
    %68 = arith.mulf %67, %11 : vector<8x128xf32>
    %69 = math.tanh %68 : vector<8x128xf32>
    %70 = arith.mulf %69, %11 : vector<8x128xf32>
    %71 = arith.addf %70, %14 : vector<8x128xf32>
    %c96_i32_39 = arith.constant 96 : i32
    %72 = tpu.dynamic_rotate %71 by %c96_i32_39 dim 1 : vector<8x128xf32>, i32 -> vector<8x128xf32>
    %c64_i32_40 = arith.constant 64 : i32
    %73 = tpu.dynamic_rotate %71 by %c64_i32_40 dim 1 : vector<8x128xf32>, i32 -> vector<8x128xf32>
    %c32_i32_41 = arith.constant 32 : i32
    %74 = tpu.dynamic_rotate %71 by %c32_i32_41 dim 1 : vector<8x128xf32>, i32 -> vector<8x128xf32>
    %c0_42 = arith.constant 0 : index
    %c0_43 = arith.constant 0 : index
    %c0_44 = arith.constant 0 : index
    %75 = vector.load %arg14[%c0_42, %c0_43, %c0_44] : memref<2x8x128xf32, #tpu.memory_space<vmem>>, vector<1x8x128xf32>
    %76 = vector.shape_cast %75 : vector<1x8x128xf32> to vector<8x128xf32>
    %77 = arith.mulf %72, %76 : vector<8x128xf32>
    %78 = arith.mulf %71, %73 : vector<8x128xf32>
    %79 = arith.addf %77, %78 : vector<8x128xf32>
    %80 = math.tanh %79 : vector<8x128xf32>
    %81 = arith.mulf %74, %80 : vector<8x128xf32>
    %82 = arith.mulf %79, %19 : vector<8x128xf32>
    %c0_45 = arith.constant 0 : index
    %c0_46 = arith.constant 0 : index
    %c0_47 = arith.constant 0 : index
    %83 = vector.load %arg14[%c0_45, %c0_46, %c0_47] : memref<2x8x128xf32, #tpu.memory_space<vmem>>, vector<1x8x128xf32>
    %84 = vector.shape_cast %83 : vector<1x8x128xf32> to vector<8x128xf32>
    %85 = vector.shape_cast %82 : vector<8x128xf32> to vector<1x8x128xf32>
    tpu.vector_store %arg14[%c0_45, %c0_46, %c0_47], %85 {strides = array<i32>} : memref<2x8x128xf32, #tpu.memory_space<vmem>>, vector<1x8x128xf32>,
    %86 = arith.mulf %81, %19 : vector<8x128xf32>
    %c0_48 = arith.constant 0 : index
    %c0_49 = arith.constant 0 : index
    %c0_50 = arith.constant 0 : index
    %87 = vector.load %arg13[%c0_48, %c0_49, %c0_50] : memref<2x8x128xf32, #tpu.memory_space<vmem>>, vector<1x8x128xf32>
    %88 = vector.shape_cast %87 : vector<1x8x128xf32> to vector<8x128xf32>
    %89 = vector.shape_cast %86 : vector<8x128xf32> to vector<1x8x128xf32>
    tpu.vector_store %arg13[%c0_48, %c0_49, %c0_50], %89 {strides = array<i32>} : memref<2x8x128xf32, #tpu.memory_space<vmem>>, vector<1x8x128xf32>,
    %90 = arith.index_cast %61 : i32 to index
    %c0_51 = arith.constant 0 : index
    %91 = vector.load %arg12[%90, %c0_51] : memref<64x128xf32, #tpu.memory_space<vmem>>, vector<8x128xf32>
    tpu.vector_store %arg12[%90, %c0_51], %86 {strides = array<i32>} : memref<64x128xf32, #tpu.memory_space<vmem>>, vector<8x128xf32>,
    %c2_i32 = arith.constant 2 : i32
    %c8_i32_52 = arith.constant 8 : i32
    %92 = arith.muli %c2_i32, %c8_i32_52 : i32
    %93 = tpu.assume_multiple %92, 8 : i32
    %c0_53 = arith.constant 0 : index
    %c0_54 = arith.constant 0 : index
    %c0_55 = arith.constant 0 : index
    %94 = vector.load %arg13[%c0_53, %c0_54, %c0_55] : memref<2x8x128xf32, #tpu.memory_space<vmem>>, vector<1x8x128xf32>
    %95 = vector.shape_cast %94 : vector<1x8x128xf32> to vector<8x128xf32>
    %96 = arith.index_cast %93 : i32 to index
    %c0_56 = arith.constant 0 : index
    %97 = vector.load %arg11[%96, %c0_56] : memref<64x128xf32, #tpu.memory_space<vmem>>, vector<8x128xf32>
    %cst_57 = arith.constant dense<0.000000e+00> : vector<8x128xf32>
    %98 = tpu.matmul %95, %21, %cst_57 {dimension_numbers = #tpu.dot_dimension_numbers<[1], [0], [0], [1], [0, 0, 1, 1], [], []>} : vector<8x128xf32>, vector<128x128xf32>, vector<8x128xf32> -> vector<8x128xf32>
    %99 = arith.addf %97, %98 : vector<8x128xf32>
    %100 = arith.mulf %99, %11 : vector<8x128xf32>
    %101 = math.tanh %100 : vector<8x128xf32>
    %102 = arith.mulf %101, %11 : vector<8x128xf32>
    %103 = arith.addf %102, %14 : vector<8x128xf32>
    %c96_i32_58 = arith.constant 96 : i32
    %104 = tpu.dynamic_rotate %103 by %c96_i32_58 dim 1 : vector<8x128xf32>, i32 -> vector<8x128xf32>
    %c64_i32_59 = arith.constant 64 : i32
    %105 = tpu.dynamic_rotate %103 by %c64_i32_59 dim 1 : vector<8x128xf32>, i32 -> vector<8x128xf32>
    %c32_i32_60 = arith.constant 32 : i32
    %106 = tpu.dynamic_rotate %103 by %c32_i32_60 dim 1 : vector<8x128xf32>, i32 -> vector<8x128xf32>
    %c0_61 = arith.constant 0 : index
    %c0_62 = arith.constant 0 : index
    %c0_63 = arith.constant 0 : index
    %107 = vector.load %arg14[%c0_61, %c0_62, %c0_63] : memref<2x8x128xf32, #tpu.memory_space<vmem>>, vector<1x8x128xf32>
    %108 = vector.shape_cast %107 : vector<1x8x128xf32> to vector<8x128xf32>
    %109 = arith.mulf %104, %108 : vector<8x128xf32>
    %110 = arith.mulf %103, %105 : vector<8x128xf32>
    %111 = arith.addf %109, %110 : vector<8x128xf32>
    %112 = math.tanh %111 : vector<8x128xf32>
    %113 = arith.mulf %106, %112 : vector<8x128xf32>
    %114 = arith.mulf %111, %19 : vector<8x128xf32>
    %c0_64 = arith.constant 0 : index
    %c0_65 = arith.constant 0 : index
    %c0_66 = arith.constant 0 : index
    %115 = vector.load %arg14[%c0_64, %c0_65, %c0_66] : memref<2x8x128xf32, #tpu.memory_space<vmem>>, vector<1x8x128xf32>
    %116 = vector.shape_cast %115 : vector<1x8x128xf32> to vector<8x128xf32>
    %117 = vector.shape_cast %114 : vector<8x128xf32> to vector<1x8x128xf32>
    tpu.vector_store %arg14[%c0_64, %c0_65, %c0_66], %117 {strides = array<i32>} : memref<2x8x128xf32, #tpu.memory_space<vmem>>, vector<1x8x128xf32>,
    %118 = arith.mulf %113, %19 : vector<8x128xf32>
    %c0_67 = arith.constant 0 : index
    %c0_68 = arith.constant 0 : index
    %c0_69 = arith.constant 0 : index
    %119 = vector.load %arg13[%c0_67, %c0_68, %c0_69] : memref<2x8x128xf32, #tpu.memory_space<vmem>>, vector<1x8x128xf32>
    %120 = vector.shape_cast %119 : vector<1x8x128xf32> to vector<8x128xf32>
    %121 = vector.shape_cast %118 : vector<8x128xf32> to vector<1x8x128xf32>
    tpu.vector_store %arg13[%c0_67, %c0_68, %c0_69], %121 {strides = array<i32>} : memref<2x8x128xf32, #tpu.memory_space<vmem>>, vector<1x8x128xf32>,
    %122 = arith.index_cast %93 : i32 to index
    %c0_70 = arith.constant 0 : index
    %123 = vector.load %arg12[%122, %c0_70] : memref<64x128xf32, #tpu.memory_space<vmem>>, vector<8x128xf32>
    tpu.vector_store %arg12[%122, %c0_70], %118 {strides = array<i32>} : memref<64x128xf32, #tpu.memory_space<vmem>>, vector<8x128xf32>,
    %c3_i32 = arith.constant 3 : i32
    %c8_i32_71 = arith.constant 8 : i32
    %124 = arith.muli %c3_i32, %c8_i32_71 : i32
    %125 = tpu.assume_multiple %124, 8 : i32
    %c0_72 = arith.constant 0 : index
    %c0_73 = arith.constant 0 : index
    %c0_74 = arith.constant 0 : index
    %126 = vector.load %arg13[%c0_72, %c0_73, %c0_74] : memref<2x8x128xf32, #tpu.memory_space<vmem>>, vector<1x8x128xf32>
    %127 = vector.shape_cast %126 : vector<1x8x128xf32> to vector<8x128xf32>
    %128 = arith.index_cast %125 : i32 to index
    %c0_75 = arith.constant 0 : index
    %129 = vector.load %arg11[%128, %c0_75] : memref<64x128xf32, #tpu.memory_space<vmem>>, vector<8x128xf32>
    %cst_76 = arith.constant dense<0.000000e+00> : vector<8x128xf32>
    %130 = tpu.matmul %127, %21, %cst_76 {dimension_numbers = #tpu.dot_dimension_numbers<[1], [0], [0], [1], [0, 0, 1, 1], [], []>} : vector<8x128xf32>, vector<128x128xf32>, vector<8x128xf32> -> vector<8x128xf32>
    %131 = arith.addf %129, %130 : vector<8x128xf32>
    %132 = arith.mulf %131, %11 : vector<8x128xf32>
    %133 = math.tanh %132 : vector<8x128xf32>
    %134 = arith.mulf %133, %11 : vector<8x128xf32>
    %135 = arith.addf %134, %14 : vector<8x128xf32>
    %c96_i32_77 = arith.constant 96 : i32
    %136 = tpu.dynamic_rotate %135 by %c96_i32_77 dim 1 : vector<8x128xf32>, i32 -> vector<8x128xf32>
    %c64_i32_78 = arith.constant 64 : i32
    %137 = tpu.dynamic_rotate %135 by %c64_i32_78 dim 1 : vector<8x128xf32>, i32 -> vector<8x128xf32>
    %c32_i32_79 = arith.constant 32 : i32
    %138 = tpu.dynamic_rotate %135 by %c32_i32_79 dim 1 : vector<8x128xf32>, i32 -> vector<8x128xf32>
    %c0_80 = arith.constant 0 : index
    %c0_81 = arith.constant 0 : index
    %c0_82 = arith.constant 0 : index
    %139 = vector.load %arg14[%c0_80, %c0_81, %c0_82] : memref<2x8x128xf32, #tpu.memory_space<vmem>>, vector<1x8x128xf32>
    %140 = vector.shape_cast %139 : vector<1x8x128xf32> to vector<8x128xf32>
    %141 = arith.mulf %136, %140 : vector<8x128xf32>
    %142 = arith.mulf %135, %137 : vector<8x128xf32>
    %143 = arith.addf %141, %142 : vector<8x128xf32>
    %144 = math.tanh %143 : vector<8x128xf32>
    %145 = arith.mulf %138, %144 : vector<8x128xf32>
    %146 = arith.mulf %143, %19 : vector<8x128xf32>
    %c0_83 = arith.constant 0 : index
    %c0_84 = arith.constant 0 : index
    %c0_85 = arith.constant 0 : index
    %147 = vector.load %arg14[%c0_83, %c0_84, %c0_85] : memref<2x8x128xf32, #tpu.memory_space<vmem>>, vector<1x8x128xf32>
    %148 = vector.shape_cast %147 : vector<1x8x128xf32> to vector<8x128xf32>
    %149 = vector.shape_cast %146 : vector<8x128xf32> to vector<1x8x128xf32>
    tpu.vector_store %arg14[%c0_83, %c0_84, %c0_85], %149 {strides = array<i32>} : memref<2x8x128xf32, #tpu.memory_space<vmem>>, vector<1x8x128xf32>,
    %150 = arith.mulf %145, %19 : vector<8x128xf32>
    %c0_86 = arith.constant 0 : index
    %c0_87 = arith.constant 0 : index
    %c0_88 = arith.constant 0 : index
    %151 = vector.load %arg13[%c0_86, %c0_87, %c0_88] : memref<2x8x128xf32, #tpu.memory_space<vmem>>, vector<1x8x128xf32>
    %152 = vector.shape_cast %151 : vector<1x8x128xf32> to vector<8x128xf32>
    %153 = vector.shape_cast %150 : vector<8x128xf32> to vector<1x8x128xf32>
    tpu.vector_store %arg13[%c0_86, %c0_87, %c0_88], %153 {strides = array<i32>} : memref<2x8x128xf32, #tpu.memory_space<vmem>>, vector<1x8x128xf32>,
    %154 = arith.index_cast %125 : i32 to index
    %c0_89 = arith.constant 0 : index
    %155 = vector.load %arg12[%154, %c0_89] : memref<64x128xf32, #tpu.memory_space<vmem>>, vector<8x128xf32>
    tpu.vector_store %arg12[%154, %c0_89], %150 {strides = array<i32>} : memref<64x128xf32, #tpu.memory_space<vmem>>, vector<8x128xf32>,
    %c4_i32 = arith.constant 4 : i32
    %c8_i32_90 = arith.constant 8 : i32
    %156 = arith.muli %c4_i32, %c8_i32_90 : i32
    %157 = tpu.assume_multiple %156, 8 : i32
    %c0_91 = arith.constant 0 : index
    %c0_92 = arith.constant 0 : index
    %c0_93 = arith.constant 0 : index
    %158 = vector.load %arg13[%c0_91, %c0_92, %c0_93] : memref<2x8x128xf32, #tpu.memory_space<vmem>>, vector<1x8x128xf32>
    %159 = vector.shape_cast %158 : vector<1x8x128xf32> to vector<8x128xf32>
    %160 = arith.index_cast %157 : i32 to index
    %c0_94 = arith.constant 0 : index
    %161 = vector.load %arg11[%160, %c0_94] : memref<64x128xf32, #tpu.memory_space<vmem>>, vector<8x128xf32>
    %cst_95 = arith.constant dense<0.000000e+00> : vector<8x128xf32>
    %162 = tpu.matmul %159, %21, %cst_95 {dimension_numbers = #tpu.dot_dimension_numbers<[1], [0], [0], [1], [0, 0, 1, 1], [], []>} : vector<8x128xf32>, vector<128x128xf32>, vector<8x128xf32> -> vector<8x128xf32>
    %163 = arith.addf %161, %162 : vector<8x128xf32>
    %164 = arith.mulf %163, %11 : vector<8x128xf32>
    %165 = math.tanh %164 : vector<8x128xf32>
    %166 = arith.mulf %165, %11 : vector<8x128xf32>
    %167 = arith.addf %166, %14 : vector<8x128xf32>
    %c96_i32_96 = arith.constant 96 : i32
    %168 = tpu.dynamic_rotate %167 by %c96_i32_96 dim 1 : vector<8x128xf32>, i32 -> vector<8x128xf32>
    %c64_i32_97 = arith.constant 64 : i32
    %169 = tpu.dynamic_rotate %167 by %c64_i32_97 dim 1 : vector<8x128xf32>, i32 -> vector<8x128xf32>
    %c32_i32_98 = arith.constant 32 : i32
    %170 = tpu.dynamic_rotate %167 by %c32_i32_98 dim 1 : vector<8x128xf32>, i32 -> vector<8x128xf32>
    %c0_99 = arith.constant 0 : index
    %c0_100 = arith.constant 0 : index
    %c0_101 = arith.constant 0 : index
    %171 = vector.load %arg14[%c0_99, %c0_100, %c0_101] : memref<2x8x128xf32, #tpu.memory_space<vmem>>, vector<1x8x128xf32>
    %172 = vector.shape_cast %171 : vector<1x8x128xf32> to vector<8x128xf32>
    %173 = arith.mulf %168, %172 : vector<8x128xf32>
    %174 = arith.mulf %167, %169 : vector<8x128xf32>
    %175 = arith.addf %173, %174 : vector<8x128xf32>
    %176 = math.tanh %175 : vector<8x128xf32>
    %177 = arith.mulf %170, %176 : vector<8x128xf32>
    %178 = arith.mulf %175, %19 : vector<8x128xf32>
    %c0_102 = arith.constant 0 : index
    %c0_103 = arith.constant 0 : index
    %c0_104 = arith.constant 0 : index
    %179 = vector.load %arg14[%c0_102, %c0_103, %c0_104] : memref<2x8x128xf32, #tpu.memory_space<vmem>>, vector<1x8x128xf32>
    %180 = vector.shape_cast %179 : vector<1x8x128xf32> to vector<8x128xf32>
    %181 = vector.shape_cast %178 : vector<8x128xf32> to vector<1x8x128xf32>
    tpu.vector_store %arg14[%c0_102, %c0_103, %c0_104], %181 {strides = array<i32>} : memref<2x8x128xf32, #tpu.memory_space<vmem>>, vector<1x8x128xf32>,
    %182 = arith.mulf %177, %19 : vector<8x128xf32>
    %c0_105 = arith.constant 0 : index
    %c0_106 = arith.constant 0 : index
    %c0_107 = arith.constant 0 : index
    %183 = vector.load %arg13[%c0_105, %c0_106, %c0_107] : memref<2x8x128xf32, #tpu.memory_space<vmem>>, vector<1x8x128xf32>
    %184 = vector.shape_cast %183 : vector<1x8x128xf32> to vector<8x128xf32>
    %185 = vector.shape_cast %182 : vector<8x128xf32> to vector<1x8x128xf32>
    tpu.vector_store %arg13[%c0_105, %c0_106, %c0_107], %185 {strides = array<i32>} : memref<2x8x128xf32, #tpu.memory_space<vmem>>, vector<1x8x128xf32>,
    %186 = arith.index_cast %157 : i32 to index
    %c0_108 = arith.constant 0 : index
    %187 = vector.load %arg12[%186, %c0_108] : memref<64x128xf32, #tpu.memory_space<vmem>>, vector<8x128xf32>
    tpu.vector_store %arg12[%186, %c0_108], %182 {strides = array<i32>} : memref<64x128xf32, #tpu.memory_space<vmem>>, vector<8x128xf32>,
    %c5_i32 = arith.constant 5 : i32
    %c8_i32_109 = arith.constant 8 : i32
    %188 = arith.muli %c5_i32, %c8_i32_109 : i32
    %189 = tpu.assume_multiple %188, 8 : i32
    %c0_110 = arith.constant 0 : index
    %c0_111 = arith.constant 0 : index
    %c0_112 = arith.constant 0 : index
    %190 = vector.load %arg13[%c0_110, %c0_111, %c0_112] : memref<2x8x128xf32, #tpu.memory_space<vmem>>, vector<1x8x128xf32>
    %191 = vector.shape_cast %190 : vector<1x8x128xf32> to vector<8x128xf32>
    %192 = arith.index_cast %189 : i32 to index
    %c0_113 = arith.constant 0 : index
    %193 = vector.load %arg11[%192, %c0_113] : memref<64x128xf32, #tpu.memory_space<vmem>>, vector<8x128xf32>
    %cst_114 = arith.constant dense<0.000000e+00> : vector<8x128xf32>
    %194 = tpu.matmul %191, %21, %cst_114 {dimension_numbers = #tpu.dot_dimension_numbers<[1], [0], [0], [1], [0, 0, 1, 1], [], []>} : vector<8x128xf32>, vector<128x128xf32>, vector<8x128xf32> -> vector<8x128xf32>
    %195 = arith.addf %193, %194 : vector<8x128xf32>
    %196 = arith.mulf %195, %11 : vector<8x128xf32>
    %197 = math.tanh %196 : vector<8x128xf32>
    %198 = arith.mulf %197, %11 : vector<8x128xf32>
    %199 = arith.addf %198, %14 : vector<8x128xf32>
    %c96_i32_115 = arith.constant 96 : i32
    %200 = tpu.dynamic_rotate %199 by %c96_i32_115 dim 1 : vector<8x128xf32>, i32 -> vector<8x128xf32>
    %c64_i32_116 = arith.constant 64 : i32
    %201 = tpu.dynamic_rotate %199 by %c64_i32_116 dim 1 : vector<8x128xf32>, i32 -> vector<8x128xf32>
    %c32_i32_117 = arith.constant 32 : i32
    %202 = tpu.dynamic_rotate %199 by %c32_i32_117 dim 1 : vector<8x128xf32>, i32 -> vector<8x128xf32>
    %c0_118 = arith.constant 0 : index
    %c0_119 = arith.constant 0 : index
    %c0_120 = arith.constant 0 : index
    %203 = vector.load %arg14[%c0_118, %c0_119, %c0_120] : memref<2x8x128xf32, #tpu.memory_space<vmem>>, vector<1x8x128xf32>
    %204 = vector.shape_cast %203 : vector<1x8x128xf32> to vector<8x128xf32>
    %205 = arith.mulf %200, %204 : vector<8x128xf32>
    %206 = arith.mulf %199, %201 : vector<8x128xf32>
    %207 = arith.addf %205, %206 : vector<8x128xf32>
    %208 = math.tanh %207 : vector<8x128xf32>
    %209 = arith.mulf %202, %208 : vector<8x128xf32>
    %210 = arith.mulf %207, %19 : vector<8x128xf32>
    %c0_121 = arith.constant 0 : index
    %c0_122 = arith.constant 0 : index
    %c0_123 = arith.constant 0 : index
    %211 = vector.load %arg14[%c0_121, %c0_122, %c0_123] : memref<2x8x128xf32, #tpu.memory_space<vmem>>, vector<1x8x128xf32>
    %212 = vector.shape_cast %211 : vector<1x8x128xf32> to vector<8x128xf32>
    %213 = vector.shape_cast %210 : vector<8x128xf32> to vector<1x8x128xf32>
    tpu.vector_store %arg14[%c0_121, %c0_122, %c0_123], %213 {strides = array<i32>} : memref<2x8x128xf32, #tpu.memory_space<vmem>>, vector<1x8x128xf32>,
    %214 = arith.mulf %209, %19 : vector<8x128xf32>
    %c0_124 = arith.constant 0 : index
    %c0_125 = arith.constant 0 : index
    %c0_126 = arith.constant 0 : index
    %215 = vector.load %arg13[%c0_124, %c0_125, %c0_126] : memref<2x8x128xf32, #tpu.memory_space<vmem>>, vector<1x8x128xf32>
    %216 = vector.shape_cast %215 : vector<1x8x128xf32> to vector<8x128xf32>
    %217 = vector.shape_cast %214 : vector<8x128xf32> to vector<1x8x128xf32>
    tpu.vector_store %arg13[%c0_124, %c0_125, %c0_126], %217 {strides = array<i32>} : memref<2x8x128xf32, #tpu.memory_space<vmem>>, vector<1x8x128xf32>,
    %218 = arith.index_cast %189 : i32 to index
    %c0_127 = arith.constant 0 : index
    %219 = vector.load %arg12[%218, %c0_127] : memref<64x128xf32, #tpu.memory_space<vmem>>, vector<8x128xf32>
    tpu.vector_store %arg12[%218, %c0_127], %214 {strides = array<i32>} : memref<64x128xf32, #tpu.memory_space<vmem>>, vector<8x128xf32>,
    %c6_i32 = arith.constant 6 : i32
    %c8_i32_128 = arith.constant 8 : i32
    %220 = arith.muli %c6_i32, %c8_i32_128 : i32
    %221 = tpu.assume_multiple %220, 8 : i32
    %c0_129 = arith.constant 0 : index
    %c0_130 = arith.constant 0 : index
    %c0_131 = arith.constant 0 : index
    %222 = vector.load %arg13[%c0_129, %c0_130, %c0_131] : memref<2x8x128xf32, #tpu.memory_space<vmem>>, vector<1x8x128xf32>
    %223 = vector.shape_cast %222 : vector<1x8x128xf32> to vector<8x128xf32>
    %224 = arith.index_cast %221 : i32 to index
    %c0_132 = arith.constant 0 : index
    %225 = vector.load %arg11[%224, %c0_132] : memref<64x128xf32, #tpu.memory_space<vmem>>, vector<8x128xf32>
    %cst_133 = arith.constant dense<0.000000e+00> : vector<8x128xf32>
    %226 = tpu.matmul %223, %21, %cst_133 {dimension_numbers = #tpu.dot_dimension_numbers<[1], [0], [0], [1], [0, 0, 1, 1], [], []>} : vector<8x128xf32>, vector<128x128xf32>, vector<8x128xf32> -> vector<8x128xf32>
    %227 = arith.addf %225, %226 : vector<8x128xf32>
    %228 = arith.mulf %227, %11 : vector<8x128xf32>
    %229 = math.tanh %228 : vector<8x128xf32>
    %230 = arith.mulf %229, %11 : vector<8x128xf32>
    %231 = arith.addf %230, %14 : vector<8x128xf32>
    %c96_i32_134 = arith.constant 96 : i32
    %232 = tpu.dynamic_rotate %231 by %c96_i32_134 dim 1 : vector<8x128xf32>, i32 -> vector<8x128xf32>
    %c64_i32_135 = arith.constant 64 : i32
    %233 = tpu.dynamic_rotate %231 by %c64_i32_135 dim 1 : vector<8x128xf32>, i32 -> vector<8x128xf32>
    %c32_i32_136 = arith.constant 32 : i32
    %234 = tpu.dynamic_rotate %231 by %c32_i32_136 dim 1 : vector<8x128xf32>, i32 -> vector<8x128xf32>
    %c0_137 = arith.constant 0 : index
    %c0_138 = arith.constant 0 : index
    %c0_139 = arith.constant 0 : index
    %235 = vector.load %arg14[%c0_137, %c0_138, %c0_139] : memref<2x8x128xf32, #tpu.memory_space<vmem>>, vector<1x8x128xf32>
    %236 = vector.shape_cast %235 : vector<1x8x128xf32> to vector<8x128xf32>
    %237 = arith.mulf %232, %236 : vector<8x128xf32>
    %238 = arith.mulf %231, %233 : vector<8x128xf32>
    %239 = arith.addf %237, %238 : vector<8x128xf32>
    %240 = math.tanh %239 : vector<8x128xf32>
    %241 = arith.mulf %234, %240 : vector<8x128xf32>
    %242 = arith.mulf %239, %19 : vector<8x128xf32>
    %c0_140 = arith.constant 0 : index
    %c0_141 = arith.constant 0 : index
    %c0_142 = arith.constant 0 : index
    %243 = vector.load %arg14[%c0_140, %c0_141, %c0_142] : memref<2x8x128xf32, #tpu.memory_space<vmem>>, vector<1x8x128xf32>
    %244 = vector.shape_cast %243 : vector<1x8x128xf32> to vector<8x128xf32>
    %245 = vector.shape_cast %242 : vector<8x128xf32> to vector<1x8x128xf32>
    tpu.vector_store %arg14[%c0_140, %c0_141, %c0_142], %245 {strides = array<i32>} : memref<2x8x128xf32, #tpu.memory_space<vmem>>, vector<1x8x128xf32>,
    %246 = arith.mulf %241, %19 : vector<8x128xf32>
    %c0_143 = arith.constant 0 : index
    %c0_144 = arith.constant 0 : index
    %c0_145 = arith.constant 0 : index
    %247 = vector.load %arg13[%c0_143, %c0_144, %c0_145] : memref<2x8x128xf32, #tpu.memory_space<vmem>>, vector<1x8x128xf32>
    %248 = vector.shape_cast %247 : vector<1x8x128xf32> to vector<8x128xf32>
    %249 = vector.shape_cast %246 : vector<8x128xf32> to vector<1x8x128xf32>
    tpu.vector_store %arg13[%c0_143, %c0_144, %c0_145], %249 {strides = array<i32>} : memref<2x8x128xf32, #tpu.memory_space<vmem>>, vector<1x8x128xf32>,
    %250 = arith.index_cast %221 : i32 to index
    %c0_146 = arith.constant 0 : index
    %251 = vector.load %arg12[%250, %c0_146] : memref<64x128xf32, #tpu.memory_space<vmem>>, vector<8x128xf32>
    tpu.vector_store %arg12[%250, %c0_146], %246 {strides = array<i32>} : memref<64x128xf32, #tpu.memory_space<vmem>>, vector<8x128xf32>,
    %c7_i32 = arith.constant 7 : i32
    %c8_i32_147 = arith.constant 8 : i32
    %252 = arith.muli %c7_i32, %c8_i32_147 : i32
    %253 = tpu.assume_multiple %252, 8 : i32
    %c0_148 = arith.constant 0 : index
    %c0_149 = arith.constant 0 : index
    %c0_150 = arith.constant 0 : index
    %254 = vector.load %arg13[%c0_148, %c0_149, %c0_150] : memref<2x8x128xf32, #tpu.memory_space<vmem>>, vector<1x8x128xf32>
    %255 = vector.shape_cast %254 : vector<1x8x128xf32> to vector<8x128xf32>
    %256 = arith.index_cast %253 : i32 to index
    %c0_151 = arith.constant 0 : index
    %257 = vector.load %arg11[%256, %c0_151] : memref<64x128xf32, #tpu.memory_space<vmem>>, vector<8x128xf32>
    %cst_152 = arith.constant dense<0.000000e+00> : vector<8x128xf32>
    %258 = tpu.matmul %255, %21, %cst_152 {dimension_numbers = #tpu.dot_dimension_numbers<[1], [0], [0], [1], [0, 0, 1, 1], [], []>} : vector<8x128xf32>, vector<128x128xf32>, vector<8x128xf32> -> vector<8x128xf32>
    %259 = arith.addf %257, %258 : vector<8x128xf32>
    %260 = arith.mulf %259, %11 : vector<8x128xf32>
    %261 = math.tanh %260 : vector<8x128xf32>
    %262 = arith.mulf %261, %11 : vector<8x128xf32>
    %263 = arith.addf %262, %14 : vector<8x128xf32>
    %c96_i32_153 = arith.constant 96 : i32
    %264 = tpu.dynamic_rotate %263 by %c96_i32_153 dim 1 : vector<8x128xf32>, i32 -> vector<8x128xf32>
    %c64_i32_154 = arith.constant 64 : i32
    %265 = tpu.dynamic_rotate %263 by %c64_i32_154 dim 1 : vector<8x128xf32>, i32 -> vector<8x128xf32>
    %c32_i32_155 = arith.constant 32 : i32
    %266 = tpu.dynamic_rotate %263 by %c32_i32_155 dim 1 : vector<8x128xf32>, i32 -> vector<8x128xf32>
    %c0_156 = arith.constant 0 : index
    %c0_157 = arith.constant 0 : index
    %c0_158 = arith.constant 0 : index
    %267 = vector.load %arg14[%c0_156, %c0_157, %c0_158] : memref<2x8x128xf32, #tpu.memory_space<vmem>>, vector<1x8x128xf32>
    %268 = vector.shape_cast %267 : vector<1x8x128xf32> to vector<8x128xf32>
    %269 = arith.mulf %264, %268 : vector<8x128xf32>
    %270 = arith.mulf %263, %265 : vector<8x128xf32>
    %271 = arith.addf %269, %270 : vector<8x128xf32>
    %272 = math.tanh %271 : vector<8x128xf32>
    %273 = arith.mulf %266, %272 : vector<8x128xf32>
    %274 = arith.mulf %271, %19 : vector<8x128xf32>
    %c0_159 = arith.constant 0 : index
    %c0_160 = arith.constant 0 : index
    %c0_161 = arith.constant 0 : index
    %275 = vector.load %arg14[%c0_159, %c0_160, %c0_161] : memref<2x8x128xf32, #tpu.memory_space<vmem>>, vector<1x8x128xf32>
    %276 = vector.shape_cast %275 : vector<1x8x128xf32> to vector<8x128xf32>
    %277 = vector.shape_cast %274 : vector<8x128xf32> to vector<1x8x128xf32>
    tpu.vector_store %arg14[%c0_159, %c0_160, %c0_161], %277 {strides = array<i32>} : memref<2x8x128xf32, #tpu.memory_space<vmem>>, vector<1x8x128xf32>,
    %278 = arith.mulf %273, %19 : vector<8x128xf32>
    %c0_162 = arith.constant 0 : index
    %c0_163 = arith.constant 0 : index
    %c0_164 = arith.constant 0 : index
    %279 = vector.load %arg13[%c0_162, %c0_163, %c0_164] : memref<2x8x128xf32, #tpu.memory_space<vmem>>, vector<1x8x128xf32>
    %280 = vector.shape_cast %279 : vector<1x8x128xf32> to vector<8x128xf32>
    %281 = vector.shape_cast %278 : vector<8x128xf32> to vector<1x8x128xf32>
    tpu.vector_store %arg13[%c0_162, %c0_163, %c0_164], %281 {strides = array<i32>} : memref<2x8x128xf32, #tpu.memory_space<vmem>>, vector<1x8x128xf32>,
    %282 = arith.index_cast %253 : i32 to index
    %c0_165 = arith.constant 0 : index
    %283 = vector.load %arg12[%282, %c0_165] : memref<64x128xf32, #tpu.memory_space<vmem>>, vector<8x128xf32>
    tpu.vector_store %arg12[%282, %c0_165], %278 {strides = array<i32>} : memref<64x128xf32, #tpu.memory_space<vmem>>, vector<8x128xf32>,
    %c8_i32_166 = arith.constant 8 : i32
    %c0_167 = arith.constant 0 : index
    %c0_168 = arith.constant 0 : index
    %284 = vector.load %arg5[%c0_167, %c0_168] : memref<128x128xf32, #tpu.memory_space<vmem>>, vector<128x128xf32>
    %c0_169 = arith.constant 0 : index
    %c0_170 = arith.constant 0 : index
    %285 = vector.load %arg6[%c0_169, %c0_170] : memref<128x128xf32, #tpu.memory_space<vmem>>, vector<128x128xf32>
    %c0_171 = arith.constant 0 : index
    %c0_172 = arith.constant 0 : index
    %286 = vector.load %arg7[%c0_171, %c0_172] : memref<1x128xf32, #tpu.memory_space<vmem>>, vector<1x128xf32>
    %c0_173 = arith.constant 0 : index
    %c0_174 = arith.constant 0 : index
    %287 = vector.load %arg12[%c0_173, %c0_174] : memref<64x128xf32, #tpu.memory_space<vmem>>, vector<64x128xf32>
    %cst_175 = arith.constant dense<0.000000e+00> : vector<64x128xf32>
    %288 = tpu.matmul %287, %284, %cst_175 {dimension_numbers = #tpu.dot_dimension_numbers<[1], [0], [0], [1], [0, 0, 1, 1], [], []>} : vector<64x128xf32>, vector<128x128xf32>, vector<64x128xf32> -> vector<64x128xf32>
    %289 = vector.broadcast %286 : vector<1x128xf32> to vector<64x128xf32>
    %290 = arith.addf %288, %289 : vector<64x128xf32>
    %c0_176 = arith.constant 0 : index
    %c0_177 = arith.constant 0 : index
    %291 = vector.load %arg11[%c0_176, %c0_177] : memref<64x128xf32, #tpu.memory_space<vmem>>, vector<64x128xf32>
    tpu.vector_store %arg11[%c0_176, %c0_177], %290 {strides = array<i32>} : memref<64x128xf32, #tpu.memory_space<vmem>>, vector<64x128xf32>,
    %c0_i32_178 = arith.constant 0 : i32
    %c8_i32_179 = arith.constant 8 : i32
    %292 = arith.muli %c0_i32_178, %c8_i32_179 : i32
    %293 = tpu.assume_multiple %292, 8 : i32
    %c1 = arith.constant 1 : index
    %c0_180 = arith.constant 0 : index
    %c0_181 = arith.constant 0 : index
    %294 = vector.load %arg13[%c1, %c0_180, %c0_181] : memref<2x8x128xf32, #tpu.memory_space<vmem>>, vector<1x8x128xf32>
    %295 = vector.shape_cast %294 : vector<1x8x128xf32> to vector<8x128xf32>
    %296 = arith.index_cast %293 : i32 to index
    %c0_182 = arith.constant 0 : index
    %297 = vector.load %arg11[%296, %c0_182] : memref<64x128xf32, #tpu.memory_space<vmem>>, vector<8x128xf32>
    %cst_183 = arith.constant dense<0.000000e+00> : vector<8x128xf32>
    %298 = tpu.matmul %295, %285, %cst_183 {dimension_numbers = #tpu.dot_dimension_numbers<[1], [0], [0], [1], [0, 0, 1, 1], [], []>} : vector<8x128xf32>, vector<128x128xf32>, vector<8x128xf32> -> vector<8x128xf32>
    %299 = arith.addf %297, %298 : vector<8x128xf32>
    %300 = arith.mulf %299, %11 : vector<8x128xf32>
    %301 = math.tanh %300 : vector<8x128xf32>
    %302 = arith.mulf %301, %11 : vector<8x128xf32>
    %303 = arith.addf %302, %14 : vector<8x128xf32>
    %c96_i32_184 = arith.constant 96 : i32
    %304 = tpu.dynamic_rotate %303 by %c96_i32_184 dim 1 : vector<8x128xf32>, i32 -> vector<8x128xf32>
    %c64_i32_185 = arith.constant 64 : i32
    %305 = tpu.dynamic_rotate %303 by %c64_i32_185 dim 1 : vector<8x128xf32>, i32 -> vector<8x128xf32>
    %c32_i32_186 = arith.constant 32 : i32
    %306 = tpu.dynamic_rotate %303 by %c32_i32_186 dim 1 : vector<8x128xf32>, i32 -> vector<8x128xf32>
    %c1_187 = arith.constant 1 : index
    %c0_188 = arith.constant 0 : index
    %c0_189 = arith.constant 0 : index
    %307 = vector.load %arg14[%c1_187, %c0_188, %c0_189] : memref<2x8x128xf32, #tpu.memory_space<vmem>>, vector<1x8x128xf32>
    %308 = vector.shape_cast %307 : vector<1x8x128xf32> to vector<8x128xf32>
    %309 = arith.mulf %304, %308 : vector<8x128xf32>
    %310 = arith.mulf %303, %305 : vector<8x128xf32>
    %311 = arith.addf %309, %310 : vector<8x128xf32>
    %312 = math.tanh %311 : vector<8x128xf32>
    %313 = arith.mulf %306, %312 : vector<8x128xf32>
    %314 = arith.mulf %311, %19 : vector<8x128xf32>
    %c1_190 = arith.constant 1 : index
    %c0_191 = arith.constant 0 : index
    %c0_192 = arith.constant 0 : index
    %315 = vector.load %arg14[%c1_190, %c0_191, %c0_192] : memref<2x8x128xf32, #tpu.memory_space<vmem>>, vector<1x8x128xf32>
    %316 = vector.shape_cast %315 : vector<1x8x128xf32> to vector<8x128xf32>
    %317 = vector.shape_cast %314 : vector<8x128xf32> to vector<1x8x128xf32>
    tpu.vector_store %arg14[%c1_190, %c0_191, %c0_192], %317 {strides = array<i32>} : memref<2x8x128xf32, #tpu.memory_space<vmem>>, vector<1x8x128xf32>,
    %318 = arith.mulf %313, %19 : vector<8x128xf32>
    %c1_193 = arith.constant 1 : index
    %c0_194 = arith.constant 0 : index
    %c0_195 = arith.constant 0 : index
    %319 = vector.load %arg13[%c1_193, %c0_194, %c0_195] : memref<2x8x128xf32, #tpu.memory_space<vmem>>, vector<1x8x128xf32>
    %320 = vector.shape_cast %319 : vector<1x8x128xf32> to vector<8x128xf32>
    %321 = vector.shape_cast %318 : vector<8x128xf32> to vector<1x8x128xf32>
    tpu.vector_store %arg13[%c1_193, %c0_194, %c0_195], %321 {strides = array<i32>} : memref<2x8x128xf32, #tpu.memory_space<vmem>>, vector<1x8x128xf32>,
    %c1_i32_196 = arith.constant 1 : i32
    %c8_i32_197 = arith.constant 8 : i32
    %322 = arith.muli %c1_i32_196, %c8_i32_197 : i32
    %323 = tpu.assume_multiple %322, 8 : i32
    %c1_198 = arith.constant 1 : index
    %c0_199 = arith.constant 0 : index
    %c0_200 = arith.constant 0 : index
    %324 = vector.load %arg13[%c1_198, %c0_199, %c0_200] : memref<2x8x128xf32, #tpu.memory_space<vmem>>, vector<1x8x128xf32>
    %325 = vector.shape_cast %324 : vector<1x8x128xf32> to vector<8x128xf32>
    %326 = arith.index_cast %323 : i32 to index
    %c0_201 = arith.constant 0 : index
    %327 = vector.load %arg11[%326, %c0_201] : memref<64x128xf32, #tpu.memory_space<vmem>>, vector<8x128xf32>
    %cst_202 = arith.constant dense<0.000000e+00> : vector<8x128xf32>
    %328 = tpu.matmul %325, %285, %cst_202 {dimension_numbers = #tpu.dot_dimension_numbers<[1], [0], [0], [1], [0, 0, 1, 1], [], []>} : vector<8x128xf32>, vector<128x128xf32>, vector<8x128xf32> -> vector<8x128xf32>
    %329 = arith.addf %327, %328 : vector<8x128xf32>
    %330 = arith.mulf %329, %11 : vector<8x128xf32>
    %331 = math.tanh %330 : vector<8x128xf32>
    %332 = arith.mulf %331, %11 : vector<8x128xf32>
    %333 = arith.addf %332, %14 : vector<8x128xf32>
    %c96_i32_203 = arith.constant 96 : i32
    %334 = tpu.dynamic_rotate %333 by %c96_i32_203 dim 1 : vector<8x128xf32>, i32 -> vector<8x128xf32>
    %c64_i32_204 = arith.constant 64 : i32
    %335 = tpu.dynamic_rotate %333 by %c64_i32_204 dim 1 : vector<8x128xf32>, i32 -> vector<8x128xf32>
    %c32_i32_205 = arith.constant 32 : i32
    %336 = tpu.dynamic_rotate %333 by %c32_i32_205 dim 1 : vector<8x128xf32>, i32 -> vector<8x128xf32>
    %c1_206 = arith.constant 1 : index
    %c0_207 = arith.constant 0 : index
    %c0_208 = arith.constant 0 : index
    %337 = vector.load %arg14[%c1_206, %c0_207, %c0_208] : memref<2x8x128xf32, #tpu.memory_space<vmem>>, vector<1x8x128xf32>
    %338 = vector.shape_cast %337 : vector<1x8x128xf32> to vector<8x128xf32>
    %339 = arith.mulf %334, %338 : vector<8x128xf32>
    %340 = arith.mulf %333, %335 : vector<8x128xf32>
    %341 = arith.addf %339, %340 : vector<8x128xf32>
    %342 = math.tanh %341 : vector<8x128xf32>
    %343 = arith.mulf %336, %342 : vector<8x128xf32>
    %344 = arith.mulf %341, %19 : vector<8x128xf32>
    %c1_209 = arith.constant 1 : index
    %c0_210 = arith.constant 0 : index
    %c0_211 = arith.constant 0 : index
    %345 = vector.load %arg14[%c1_209, %c0_210, %c0_211] : memref<2x8x128xf32, #tpu.memory_space<vmem>>, vector<1x8x128xf32>
    %346 = vector.shape_cast %345 : vector<1x8x128xf32> to vector<8x128xf32>
    %347 = vector.shape_cast %344 : vector<8x128xf32> to vector<1x8x128xf32>
    tpu.vector_store %arg14[%c1_209, %c0_210, %c0_211], %347 {strides = array<i32>} : memref<2x8x128xf32, #tpu.memory_space<vmem>>, vector<1x8x128xf32>,
    %348 = arith.mulf %343, %19 : vector<8x128xf32>
    %c1_212 = arith.constant 1 : index
    %c0_213 = arith.constant 0 : index
    %c0_214 = arith.constant 0 : index
    %349 = vector.load %arg13[%c1_212, %c0_213, %c0_214] : memref<2x8x128xf32, #tpu.memory_space<vmem>>, vector<1x8x128xf32>
    %350 = vector.shape_cast %349 : vector<1x8x128xf32> to vector<8x128xf32>
    %351 = vector.shape_cast %348 : vector<8x128xf32> to vector<1x8x128xf32>
    tpu.vector_store %arg13[%c1_212, %c0_213, %c0_214], %351 {strides = array<i32>} : memref<2x8x128xf32, #tpu.memory_space<vmem>>, vector<1x8x128xf32>,
    %c2_i32_215 = arith.constant 2 : i32
    %c8_i32_216 = arith.constant 8 : i32
    %352 = arith.muli %c2_i32_215, %c8_i32_216 : i32
    %353 = tpu.assume_multiple %352, 8 : i32
    %c1_217 = arith.constant 1 : index
    %c0_218 = arith.constant 0 : index
    %c0_219 = arith.constant 0 : index
    %354 = vector.load %arg13[%c1_217, %c0_218, %c0_219] : memref<2x8x128xf32, #tpu.memory_space<vmem>>, vector<1x8x128xf32>
    %355 = vector.shape_cast %354 : vector<1x8x128xf32> to vector<8x128xf32>
    %356 = arith.index_cast %353 : i32 to index
    %c0_220 = arith.constant 0 : index
    %357 = vector.load %arg11[%356, %c0_220] : memref<64x128xf32, #tpu.memory_space<vmem>>, vector<8x128xf32>
    %cst_221 = arith.constant dense<0.000000e+00> : vector<8x128xf32>
    %358 = tpu.matmul %355, %285, %cst_221 {dimension_numbers = #tpu.dot_dimension_numbers<[1], [0], [0], [1], [0, 0, 1, 1], [], []>} : vector<8x128xf32>, vector<128x128xf32>, vector<8x128xf32> -> vector<8x128xf32>
    %359 = arith.addf %357, %358 : vector<8x128xf32>
    %360 = arith.mulf %359, %11 : vector<8x128xf32>
    %361 = math.tanh %360 : vector<8x128xf32>
    %362 = arith.mulf %361, %11 : vector<8x128xf32>
    %363 = arith.addf %362, %14 : vector<8x128xf32>
    %c96_i32_222 = arith.constant 96 : i32
    %364 = tpu.dynamic_rotate %363 by %c96_i32_222 dim 1 : vector<8x128xf32>, i32 -> vector<8x128xf32>
    %c64_i32_223 = arith.constant 64 : i32
    %365 = tpu.dynamic_rotate %363 by %c64_i32_223 dim 1 : vector<8x128xf32>, i32 -> vector<8x128xf32>
    %c32_i32_224 = arith.constant 32 : i32
    %366 = tpu.dynamic_rotate %363 by %c32_i32_224 dim 1 : vector<8x128xf32>, i32 -> vector<8x128xf32>
    %c1_225 = arith.constant 1 : index
    %c0_226 = arith.constant 0 : index
    %c0_227 = arith.constant 0 : index
    %367 = vector.load %arg14[%c1_225, %c0_226, %c0_227] : memref<2x8x128xf32, #tpu.memory_space<vmem>>, vector<1x8x128xf32>
    %368 = vector.shape_cast %367 : vector<1x8x128xf32> to vector<8x128xf32>
    %369 = arith.mulf %364, %368 : vector<8x128xf32>
    %370 = arith.mulf %363, %365 : vector<8x128xf32>
    %371 = arith.addf %369, %370 : vector<8x128xf32>
    %372 = math.tanh %371 : vector<8x128xf32>
    %373 = arith.mulf %366, %372 : vector<8x128xf32>
    %374 = arith.mulf %371, %19 : vector<8x128xf32>
    %c1_228 = arith.constant 1 : index
    %c0_229 = arith.constant 0 : index
    %c0_230 = arith.constant 0 : index
    %375 = vector.load %arg14[%c1_228, %c0_229, %c0_230] : memref<2x8x128xf32, #tpu.memory_space<vmem>>, vector<1x8x128xf32>
    %376 = vector.shape_cast %375 : vector<1x8x128xf32> to vector<8x128xf32>
    %377 = vector.shape_cast %374 : vector<8x128xf32> to vector<1x8x128xf32>
    tpu.vector_store %arg14[%c1_228, %c0_229, %c0_230], %377 {strides = array<i32>} : memref<2x8x128xf32, #tpu.memory_space<vmem>>, vector<1x8x128xf32>,
    %378 = arith.mulf %373, %19 : vector<8x128xf32>
    %c1_231 = arith.constant 1 : index
    %c0_232 = arith.constant 0 : index
    %c0_233 = arith.constant 0 : index
    %379 = vector.load %arg13[%c1_231, %c0_232, %c0_233] : memref<2x8x128xf32, #tpu.memory_space<vmem>>, vector<1x8x128xf32>
    %380 = vector.shape_cast %379 : vector<1x8x128xf32> to vector<8x128xf32>
    %381 = vector.shape_cast %378 : vector<8x128xf32> to vector<1x8x128xf32>
    tpu.vector_store %arg13[%c1_231, %c0_232, %c0_233], %381 {strides = array<i32>} : memref<2x8x128xf32, #tpu.memory_space<vmem>>, vector<1x8x128xf32>,
    %c3_i32_234 = arith.constant 3 : i32
    %c8_i32_235 = arith.constant 8 : i32
    %382 = arith.muli %c3_i32_234, %c8_i32_235 : i32
    %383 = tpu.assume_multiple %382, 8 : i32
    %c1_236 = arith.constant 1 : index
    %c0_237 = arith.constant 0 : index
    %c0_238 = arith.constant 0 : index
    %384 = vector.load %arg13[%c1_236, %c0_237, %c0_238] : memref<2x8x128xf32, #tpu.memory_space<vmem>>, vector<1x8x128xf32>
    %385 = vector.shape_cast %384 : vector<1x8x128xf32> to vector<8x128xf32>
    %386 = arith.index_cast %383 : i32 to index
    %c0_239 = arith.constant 0 : index
    %387 = vector.load %arg11[%386, %c0_239] : memref<64x128xf32, #tpu.memory_space<vmem>>, vector<8x128xf32>
    %cst_240 = arith.constant dense<0.000000e+00> : vector<8x128xf32>
    %388 = tpu.matmul %385, %285, %cst_240 {dimension_numbers = #tpu.dot_dimension_numbers<[1], [0], [0], [1], [0, 0, 1, 1], [], []>} : vector<8x128xf32>, vector<128x128xf32>, vector<8x128xf32> -> vector<8x128xf32>
    %389 = arith.addf %387, %388 : vector<8x128xf32>
    %390 = arith.mulf %389, %11 : vector<8x128xf32>
    %391 = math.tanh %390 : vector<8x128xf32>
    %392 = arith.mulf %391, %11 : vector<8x128xf32>
    %393 = arith.addf %392, %14 : vector<8x128xf32>
    %c96_i32_241 = arith.constant 96 : i32
    %394 = tpu.dynamic_rotate %393 by %c96_i32_241 dim 1 : vector<8x128xf32>, i32 -> vector<8x128xf32>
    %c64_i32_242 = arith.constant 64 : i32
    %395 = tpu.dynamic_rotate %393 by %c64_i32_242 dim 1 : vector<8x128xf32>, i32 -> vector<8x128xf32>
    %c32_i32_243 = arith.constant 32 : i32
    %396 = tpu.dynamic_rotate %393 by %c32_i32_243 dim 1 : vector<8x128xf32>, i32 -> vector<8x128xf32>
    %c1_244 = arith.constant 1 : index
    %c0_245 = arith.constant 0 : index
    %c0_246 = arith.constant 0 : index
    %397 = vector.load %arg14[%c1_244, %c0_245, %c0_246] : memref<2x8x128xf32, #tpu.memory_space<vmem>>, vector<1x8x128xf32>
    %398 = vector.shape_cast %397 : vector<1x8x128xf32> to vector<8x128xf32>
    %399 = arith.mulf %394, %398 : vector<8x128xf32>
    %400 = arith.mulf %393, %395 : vector<8x128xf32>
    %401 = arith.addf %399, %400 : vector<8x128xf32>
    %402 = math.tanh %401 : vector<8x128xf32>
    %403 = arith.mulf %396, %402 : vector<8x128xf32>
    %404 = arith.mulf %401, %19 : vector<8x128xf32>
    %c1_247 = arith.constant 1 : index
    %c0_248 = arith.constant 0 : index
    %c0_249 = arith.constant 0 : index
    %405 = vector.load %arg14[%c1_247, %c0_248, %c0_249] : memref<2x8x128xf32, #tpu.memory_space<vmem>>, vector<1x8x128xf32>
    %406 = vector.shape_cast %405 : vector<1x8x128xf32> to vector<8x128xf32>
    %407 = vector.shape_cast %404 : vector<8x128xf32> to vector<1x8x128xf32>
    tpu.vector_store %arg14[%c1_247, %c0_248, %c0_249], %407 {strides = array<i32>} : memref<2x8x128xf32, #tpu.memory_space<vmem>>, vector<1x8x128xf32>,
    %408 = arith.mulf %403, %19 : vector<8x128xf32>
    %c1_250 = arith.constant 1 : index
    %c0_251 = arith.constant 0 : index
    %c0_252 = arith.constant 0 : index
    %409 = vector.load %arg13[%c1_250, %c0_251, %c0_252] : memref<2x8x128xf32, #tpu.memory_space<vmem>>, vector<1x8x128xf32>
    %410 = vector.shape_cast %409 : vector<1x8x128xf32> to vector<8x128xf32>
    %411 = vector.shape_cast %408 : vector<8x128xf32> to vector<1x8x128xf32>
    tpu.vector_store %arg13[%c1_250, %c0_251, %c0_252], %411 {strides = array<i32>} : memref<2x8x128xf32, #tpu.memory_space<vmem>>, vector<1x8x128xf32>,
    %c4_i32_253 = arith.constant 4 : i32
    %c8_i32_254 = arith.constant 8 : i32
    %412 = arith.muli %c4_i32_253, %c8_i32_254 : i32
    %413 = tpu.assume_multiple %412, 8 : i32
    %c1_255 = arith.constant 1 : index
    %c0_256 = arith.constant 0 : index
    %c0_257 = arith.constant 0 : index
    %414 = vector.load %arg13[%c1_255, %c0_256, %c0_257] : memref<2x8x128xf32, #tpu.memory_space<vmem>>, vector<1x8x128xf32>
    %415 = vector.shape_cast %414 : vector<1x8x128xf32> to vector<8x128xf32>
    %416 = arith.index_cast %413 : i32 to index
    %c0_258 = arith.constant 0 : index
    %417 = vector.load %arg11[%416, %c0_258] : memref<64x128xf32, #tpu.memory_space<vmem>>, vector<8x128xf32>
    %cst_259 = arith.constant dense<0.000000e+00> : vector<8x128xf32>
    %418 = tpu.matmul %415, %285, %cst_259 {dimension_numbers = #tpu.dot_dimension_numbers<[1], [0], [0], [1], [0, 0, 1, 1], [], []>} : vector<8x128xf32>, vector<128x128xf32>, vector<8x128xf32> -> vector<8x128xf32>
    %419 = arith.addf %417, %418 : vector<8x128xf32>
    %420 = arith.mulf %419, %11 : vector<8x128xf32>
    %421 = math.tanh %420 : vector<8x128xf32>
    %422 = arith.mulf %421, %11 : vector<8x128xf32>
    %423 = arith.addf %422, %14 : vector<8x128xf32>
    %c96_i32_260 = arith.constant 96 : i32
    %424 = tpu.dynamic_rotate %423 by %c96_i32_260 dim 1 : vector<8x128xf32>, i32 -> vector<8x128xf32>
    %c64_i32_261 = arith.constant 64 : i32
    %425 = tpu.dynamic_rotate %423 by %c64_i32_261 dim 1 : vector<8x128xf32>, i32 -> vector<8x128xf32>
    %c32_i32_262 = arith.constant 32 : i32
    %426 = tpu.dynamic_rotate %423 by %c32_i32_262 dim 1 : vector<8x128xf32>, i32 -> vector<8x128xf32>
    %c1_263 = arith.constant 1 : index
    %c0_264 = arith.constant 0 : index
    %c0_265 = arith.constant 0 : index
    %427 = vector.load %arg14[%c1_263, %c0_264, %c0_265] : memref<2x8x128xf32, #tpu.memory_space<vmem>>, vector<1x8x128xf32>
    %428 = vector.shape_cast %427 : vector<1x8x128xf32> to vector<8x128xf32>
    %429 = arith.mulf %424, %428 : vector<8x128xf32>
    %430 = arith.mulf %423, %425 : vector<8x128xf32>
    %431 = arith.addf %429, %430 : vector<8x128xf32>
    %432 = math.tanh %431 : vector<8x128xf32>
    %433 = arith.mulf %426, %432 : vector<8x128xf32>
    %434 = arith.mulf %431, %19 : vector<8x128xf32>
    %c1_266 = arith.constant 1 : index
    %c0_267 = arith.constant 0 : index
    %c0_268 = arith.constant 0 : index
    %435 = vector.load %arg14[%c1_266, %c0_267, %c0_268] : memref<2x8x128xf32, #tpu.memory_space<vmem>>, vector<1x8x128xf32>
    %436 = vector.shape_cast %435 : vector<1x8x128xf32> to vector<8x128xf32>
    %437 = vector.shape_cast %434 : vector<8x128xf32> to vector<1x8x128xf32>
    tpu.vector_store %arg14[%c1_266, %c0_267, %c0_268], %437 {strides = array<i32>} : memref<2x8x128xf32, #tpu.memory_space<vmem>>, vector<1x8x128xf32>,
    %438 = arith.mulf %433, %19 : vector<8x128xf32>
    %c1_269 = arith.constant 1 : index
    %c0_270 = arith.constant 0 : index
    %c0_271 = arith.constant 0 : index
    %439 = vector.load %arg13[%c1_269, %c0_270, %c0_271] : memref<2x8x128xf32, #tpu.memory_space<vmem>>, vector<1x8x128xf32>
    %440 = vector.shape_cast %439 : vector<1x8x128xf32> to vector<8x128xf32>
    %441 = vector.shape_cast %438 : vector<8x128xf32> to vector<1x8x128xf32>
    tpu.vector_store %arg13[%c1_269, %c0_270, %c0_271], %441 {strides = array<i32>} : memref<2x8x128xf32, #tpu.memory_space<vmem>>, vector<1x8x128xf32>,
    %c5_i32_272 = arith.constant 5 : i32
    %c8_i32_273 = arith.constant 8 : i32
    %442 = arith.muli %c5_i32_272, %c8_i32_273 : i32
    %443 = tpu.assume_multiple %442, 8 : i32
    %c1_274 = arith.constant 1 : index
    %c0_275 = arith.constant 0 : index
    %c0_276 = arith.constant 0 : index
    %444 = vector.load %arg13[%c1_274, %c0_275, %c0_276] : memref<2x8x128xf32, #tpu.memory_space<vmem>>, vector<1x8x128xf32>
    %445 = vector.shape_cast %444 : vector<1x8x128xf32> to vector<8x128xf32>
    %446 = arith.index_cast %443 : i32 to index
    %c0_277 = arith.constant 0 : index
    %447 = vector.load %arg11[%446, %c0_277] : memref<64x128xf32, #tpu.memory_space<vmem>>, vector<8x128xf32>
    %cst_278 = arith.constant dense<0.000000e+00> : vector<8x128xf32>
    %448 = tpu.matmul %445, %285, %cst_278 {dimension_numbers = #tpu.dot_dimension_numbers<[1], [0], [0], [1], [0, 0, 1, 1], [], []>} : vector<8x128xf32>, vector<128x128xf32>, vector<8x128xf32> -> vector<8x128xf32>
    %449 = arith.addf %447, %448 : vector<8x128xf32>
    %450 = arith.mulf %449, %11 : vector<8x128xf32>
    %451 = math.tanh %450 : vector<8x128xf32>
    %452 = arith.mulf %451, %11 : vector<8x128xf32>
    %453 = arith.addf %452, %14 : vector<8x128xf32>
    %c96_i32_279 = arith.constant 96 : i32
    %454 = tpu.dynamic_rotate %453 by %c96_i32_279 dim 1 : vector<8x128xf32>, i32 -> vector<8x128xf32>
    %c64_i32_280 = arith.constant 64 : i32
    %455 = tpu.dynamic_rotate %453 by %c64_i32_280 dim 1 : vector<8x128xf32>, i32 -> vector<8x128xf32>
    %c32_i32_281 = arith.constant 32 : i32
    %456 = tpu.dynamic_rotate %453 by %c32_i32_281 dim 1 : vector<8x128xf32>, i32 -> vector<8x128xf32>
    %c1_282 = arith.constant 1 : index
    %c0_283 = arith.constant 0 : index
    %c0_284 = arith.constant 0 : index
    %457 = vector.load %arg14[%c1_282, %c0_283, %c0_284] : memref<2x8x128xf32, #tpu.memory_space<vmem>>, vector<1x8x128xf32>
    %458 = vector.shape_cast %457 : vector<1x8x128xf32> to vector<8x128xf32>
    %459 = arith.mulf %454, %458 : vector<8x128xf32>
    %460 = arith.mulf %453, %455 : vector<8x128xf32>
    %461 = arith.addf %459, %460 : vector<8x128xf32>
    %462 = math.tanh %461 : vector<8x128xf32>
    %463 = arith.mulf %456, %462 : vector<8x128xf32>
    %464 = arith.mulf %461, %19 : vector<8x128xf32>
    %c1_285 = arith.constant 1 : index
    %c0_286 = arith.constant 0 : index
    %c0_287 = arith.constant 0 : index
    %465 = vector.load %arg14[%c1_285, %c0_286, %c0_287] : memref<2x8x128xf32, #tpu.memory_space<vmem>>, vector<1x8x128xf32>
    %466 = vector.shape_cast %465 : vector<1x8x128xf32> to vector<8x128xf32>
    %467 = vector.shape_cast %464 : vector<8x128xf32> to vector<1x8x128xf32>
    tpu.vector_store %arg14[%c1_285, %c0_286, %c0_287], %467 {strides = array<i32>} : memref<2x8x128xf32, #tpu.memory_space<vmem>>, vector<1x8x128xf32>,
    %468 = arith.mulf %463, %19 : vector<8x128xf32>
    %c1_288 = arith.constant 1 : index
    %c0_289 = arith.constant 0 : index
    %c0_290 = arith.constant 0 : index
    %469 = vector.load %arg13[%c1_288, %c0_289, %c0_290] : memref<2x8x128xf32, #tpu.memory_space<vmem>>, vector<1x8x128xf32>
    %470 = vector.shape_cast %469 : vector<1x8x128xf32> to vector<8x128xf32>
    %471 = vector.shape_cast %468 : vector<8x128xf32> to vector<1x8x128xf32>
    tpu.vector_store %arg13[%c1_288, %c0_289, %c0_290], %471 {strides = array<i32>} : memref<2x8x128xf32, #tpu.memory_space<vmem>>, vector<1x8x128xf32>,
    %c6_i32_291 = arith.constant 6 : i32
    %c8_i32_292 = arith.constant 8 : i32
    %472 = arith.muli %c6_i32_291, %c8_i32_292 : i32
    %473 = tpu.assume_multiple %472, 8 : i32
    %c1_293 = arith.constant 1 : index
    %c0_294 = arith.constant 0 : index
    %c0_295 = arith.constant 0 : index
    %474 = vector.load %arg13[%c1_293, %c0_294, %c0_295] : memref<2x8x128xf32, #tpu.memory_space<vmem>>, vector<1x8x128xf32>
    %475 = vector.shape_cast %474 : vector<1x8x128xf32> to vector<8x128xf32>
    %476 = arith.index_cast %473 : i32 to index
    %c0_296 = arith.constant 0 : index
    %477 = vector.load %arg11[%476, %c0_296] : memref<64x128xf32, #tpu.memory_space<vmem>>, vector<8x128xf32>
    %cst_297 = arith.constant dense<0.000000e+00> : vector<8x128xf32>
    %478 = tpu.matmul %475, %285, %cst_297 {dimension_numbers = #tpu.dot_dimension_numbers<[1], [0], [0], [1], [0, 0, 1, 1], [], []>} : vector<8x128xf32>, vector<128x128xf32>, vector<8x128xf32> -> vector<8x128xf32>
    %479 = arith.addf %477, %478 : vector<8x128xf32>
    %480 = arith.mulf %479, %11 : vector<8x128xf32>
    %481 = math.tanh %480 : vector<8x128xf32>
    %482 = arith.mulf %481, %11 : vector<8x128xf32>
    %483 = arith.addf %482, %14 : vector<8x128xf32>
    %c96_i32_298 = arith.constant 96 : i32
    %484 = tpu.dynamic_rotate %483 by %c96_i32_298 dim 1 : vector<8x128xf32>, i32 -> vector<8x128xf32>
    %c64_i32_299 = arith.constant 64 : i32
    %485 = tpu.dynamic_rotate %483 by %c64_i32_299 dim 1 : vector<8x128xf32>, i32 -> vector<8x128xf32>
    %c32_i32_300 = arith.constant 32 : i32
    %486 = tpu.dynamic_rotate %483 by %c32_i32_300 dim 1 : vector<8x128xf32>, i32 -> vector<8x128xf32>
    %c1_301 = arith.constant 1 : index
    %c0_302 = arith.constant 0 : index
    %c0_303 = arith.constant 0 : index
    %487 = vector.load %arg14[%c1_301, %c0_302, %c0_303] : memref<2x8x128xf32, #tpu.memory_space<vmem>>, vector<1x8x128xf32>
    %488 = vector.shape_cast %487 : vector<1x8x128xf32> to vector<8x128xf32>
    %489 = arith.mulf %484, %488 : vector<8x128xf32>
    %490 = arith.mulf %483, %485 : vector<8x128xf32>
    %491 = arith.addf %489, %490 : vector<8x128xf32>
    %492 = math.tanh %491 : vector<8x128xf32>
    %493 = arith.mulf %486, %492 : vector<8x128xf32>
    %494 = arith.mulf %491, %19 : vector<8x128xf32>
    %c1_304 = arith.constant 1 : index
    %c0_305 = arith.constant 0 : index
    %c0_306 = arith.constant 0 : index
    %495 = vector.load %arg14[%c1_304, %c0_305, %c0_306] : memref<2x8x128xf32, #tpu.memory_space<vmem>>, vector<1x8x128xf32>
    %496 = vector.shape_cast %495 : vector<1x8x128xf32> to vector<8x128xf32>
    %497 = vector.shape_cast %494 : vector<8x128xf32> to vector<1x8x128xf32>
    tpu.vector_store %arg14[%c1_304, %c0_305, %c0_306], %497 {strides = array<i32>} : memref<2x8x128xf32, #tpu.memory_space<vmem>>, vector<1x8x128xf32>,
    %498 = arith.mulf %493, %19 : vector<8x128xf32>
    %c1_307 = arith.constant 1 : index
    %c0_308 = arith.constant 0 : index
    %c0_309 = arith.constant 0 : index
    %499 = vector.load %arg13[%c1_307, %c0_308, %c0_309] : memref<2x8x128xf32, #tpu.memory_space<vmem>>, vector<1x8x128xf32>
    %500 = vector.shape_cast %499 : vector<1x8x128xf32> to vector<8x128xf32>
    %501 = vector.shape_cast %498 : vector<8x128xf32> to vector<1x8x128xf32>
    tpu.vector_store %arg13[%c1_307, %c0_308, %c0_309], %501 {strides = array<i32>} : memref<2x8x128xf32, #tpu.memory_space<vmem>>, vector<1x8x128xf32>,
    %c7_i32_310 = arith.constant 7 : i32
    %c8_i32_311 = arith.constant 8 : i32
    %502 = arith.muli %c7_i32_310, %c8_i32_311 : i32
    %503 = tpu.assume_multiple %502, 8 : i32
    %c1_312 = arith.constant 1 : index
    %c0_313 = arith.constant 0 : index
    %c0_314 = arith.constant 0 : index
    %504 = vector.load %arg13[%c1_312, %c0_313, %c0_314] : memref<2x8x128xf32, #tpu.memory_space<vmem>>, vector<1x8x128xf32>
    %505 = vector.shape_cast %504 : vector<1x8x128xf32> to vector<8x128xf32>
    %506 = arith.index_cast %503 : i32 to index
    %c0_315 = arith.constant 0 : index
    %507 = vector.load %arg11[%506, %c0_315] : memref<64x128xf32, #tpu.memory_space<vmem>>, vector<8x128xf32>
    %cst_316 = arith.constant dense<0.000000e+00> : vector<8x128xf32>
    %508 = tpu.matmul %505, %285, %cst_316 {dimension_numbers = #tpu.dot_dimension_numbers<[1], [0], [0], [1], [0, 0, 1, 1], [], []>} : vector<8x128xf32>, vector<128x128xf32>, vector<8x128xf32> -> vector<8x128xf32>
    %509 = arith.addf %507, %508 : vector<8x128xf32>
    %510 = arith.mulf %509, %11 : vector<8x128xf32>
    %511 = math.tanh %510 : vector<8x128xf32>
    %512 = arith.mulf %511, %11 : vector<8x128xf32>
    %513 = arith.addf %512, %14 : vector<8x128xf32>
    %c96_i32_317 = arith.constant 96 : i32
    %514 = tpu.dynamic_rotate %513 by %c96_i32_317 dim 1 : vector<8x128xf32>, i32 -> vector<8x128xf32>
    %c64_i32_318 = arith.constant 64 : i32
    %515 = tpu.dynamic_rotate %513 by %c64_i32_318 dim 1 : vector<8x128xf32>, i32 -> vector<8x128xf32>
    %c32_i32_319 = arith.constant 32 : i32
    %516 = tpu.dynamic_rotate %513 by %c32_i32_319 dim 1 : vector<8x128xf32>, i32 -> vector<8x128xf32>
    %c1_320 = arith.constant 1 : index
    %c0_321 = arith.constant 0 : index
    %c0_322 = arith.constant 0 : index
    %517 = vector.load %arg14[%c1_320, %c0_321, %c0_322] : memref<2x8x128xf32, #tpu.memory_space<vmem>>, vector<1x8x128xf32>
    %518 = vector.shape_cast %517 : vector<1x8x128xf32> to vector<8x128xf32>
    %519 = arith.mulf %514, %518 : vector<8x128xf32>
    %520 = arith.mulf %513, %515 : vector<8x128xf32>
    %521 = arith.addf %519, %520 : vector<8x128xf32>
    %522 = math.tanh %521 : vector<8x128xf32>
    %523 = arith.mulf %516, %522 : vector<8x128xf32>
    %524 = arith.mulf %521, %19 : vector<8x128xf32>
    %c1_323 = arith.constant 1 : index
    %c0_324 = arith.constant 0 : index
    %c0_325 = arith.constant 0 : index
    %525 = vector.load %arg14[%c1_323, %c0_324, %c0_325] : memref<2x8x128xf32, #tpu.memory_space<vmem>>, vector<1x8x128xf32>
    %526 = vector.shape_cast %525 : vector<1x8x128xf32> to vector<8x128xf32>
    %527 = vector.shape_cast %524 : vector<8x128xf32> to vector<1x8x128xf32>
    tpu.vector_store %arg14[%c1_323, %c0_324, %c0_325], %527 {strides = array<i32>} : memref<2x8x128xf32, #tpu.memory_space<vmem>>, vector<1x8x128xf32>,
    %528 = arith.mulf %523, %19 : vector<8x128xf32>
    %c1_326 = arith.constant 1 : index
    %c0_327 = arith.constant 0 : index
    %c0_328 = arith.constant 0 : index
    %529 = vector.load %arg13[%c1_326, %c0_327, %c0_328] : memref<2x8x128xf32, #tpu.memory_space<vmem>>, vector<1x8x128xf32>
    %530 = vector.shape_cast %529 : vector<1x8x128xf32> to vector<8x128xf32>
    %531 = vector.shape_cast %528 : vector<8x128xf32> to vector<1x8x128xf32>
    tpu.vector_store %arg13[%c1_326, %c0_327, %c0_328], %531 {strides = array<i32>} : memref<2x8x128xf32, #tpu.memory_space<vmem>>, vector<1x8x128xf32>,
    %c8_i32_329 = arith.constant 8 : i32
    %c0_i32_330 = arith.constant 0 : i32
    %532 = arith.cmpi eq, %arg0, %c0_i32_330 : i32
    %533 = arith.extui %532 : i1 to i32
    %c0_i32_331 = arith.constant 0 : i32
    %534 = arith.cmpi ne, %533, %c0_i32_331 : i32
    scf.if %534 {
      %c0_332 = arith.constant 0 : index
      %c0_333 = arith.constant 0 : index
      %535 = vector.load %arg8[%c0_332, %c0_333] : memref<128x128xf32, #tpu.memory_space<vmem>>, vector<128x128xf32>
      %c1_334 = arith.constant 1 : index
      %c0_335 = arith.constant 0 : index
      %c0_336 = arith.constant 0 : index
      %536 = vector.load %arg13[%c1_334, %c0_335, %c0_336] : memref<2x8x128xf32, #tpu.memory_space<vmem>>, vector<1x8x128xf32>
      %537 = vector.shape_cast %536 : vector<1x8x128xf32> to vector<8x128xf32>
      %cst_337 = arith.constant dense<0.000000e+00> : vector<8x128xf32>
      %538 = tpu.matmul %537, %535, %cst_337 {dimension_numbers = #tpu.dot_dimension_numbers<[1], [0], [0], [1], [0, 0, 1, 1], [], []>} : vector<8x128xf32>, vector<128x128xf32>, vector<8x128xf32> -> vector<8x128xf32>
      %c0_338 = arith.constant 0 : index
      %c0_339 = arith.constant 0 : index
      %539 = vector.load %arg9[%c0_338, %c0_339] : memref<1x128xf32, #tpu.memory_space<vmem>>, vector<1x128xf32>
      %540 = vector.broadcast %539 : vector<1x128xf32> to vector<8x128xf32>
      %541 = arith.addf %538, %540 : vector<8x128xf32>
      %542 = tpu.iota {dimensions = array<i32: 1>} : vector<8x128xi32>
      %c4_i32_340 = arith.constant 4 : i32
      %543 = vector.broadcast %c4_i32_340 : i32 to vector<8x128xi32>
      %544 = arith.cmpi slt, %542, %543 : vector<8x128xi32>
      %cst_341 = arith.constant -1.000000e+30 : f32
      %545 = vector.broadcast %cst_341 : f32 to vector<8x128xf32>
      %546 = arith.select %544, %541, %545 : vector<8x128xi1>, vector<8x128xf32>
      %cst_342 = arith.constant dense<0xFF800000> : vector<8xf32>
      %547 = vector.multi_reduction <maximumf>, %546, %cst_342 [1] : vector<8x128xf32> to vector<8xf32>
      %548 = vector.shape_cast %547 : vector<8xf32> to vector<8x1xf32>
      %549 = vector.broadcast %548 : vector<8x1xf32> to vector<8x128xf32>
      %550 = arith.subf %546, %549 : vector<8x128xf32>
      %551 = math.exp %550 : vector<8x128xf32>
      %cst_343 = arith.constant dense<0.000000e+00> : vector<8xf32>
      %552 = vector.multi_reduction <add>, %551, %cst_343 [1] : vector<8x128xf32> to vector<8xf32>
      %553 = vector.shape_cast %552 : vector<8xf32> to vector<8x1xf32>
      %554 = tpu.reciprocal %553 {approx = true} : vector<8x1xf32> -> vector<8x1xf32>
      %555 = arith.mulf %553, %554 : vector<8x1xf32>
      %cst_344 = arith.constant 2.000000e+00 : f32
      %556 = vector.broadcast %cst_344 : f32 to vector<8x1xf32>
      %557 = arith.subf %556, %555 : vector<8x1xf32>
      %558 = arith.mulf %554, %557 : vector<8x1xf32>
      %559 = vector.broadcast %558 : vector<8x1xf32> to vector<8x128xf32>
      %560 = arith.mulf %551, %559 : vector<8x128xf32>
      %c0_345 = arith.constant 0 : index
      %c0_346 = arith.constant 0 : index
      %561 = vector.load %arg10[%c0_345, %c0_346] : memref<8x128xf32, #tpu.memory_space<vmem>>, vector<8x128xf32>
      tpu.vector_store %arg10[%c0_345, %c0_346], %560 {strides = array<i32>} : memref<8x128xf32, #tpu.memory_space<vmem>>, vector<8x128xf32>,
    } else {
    }
    return
  }
  func.func @transform_0(%arg0: i32) -> (i32, i32) {
    %c0_i32 = arith.constant 0 : i32
    %c0_i32_0 = arith.constant 0 : i32
    return %arg0, %c0_i32 : i32, i32
  }
  func.func @transform_1(%arg0: i32) -> (i32, i32) {
    %c0_i32 = arith.constant 0 : i32
    %c0_i32_0 = arith.constant 0 : i32
    %c0_i32_1 = arith.constant 0 : i32
    return %c0_i32, %c0_i32_0 : i32, i32
  }
  func.func @transform_2(%arg0: i32) -> (i32, i32) {
    %c0_i32 = arith.constant 0 : i32
    %c0_i32_0 = arith.constant 0 : i32
    %c0_i32_1 = arith.constant 0 : i32
    return %c0_i32, %c0_i32_0 : i32, i32
  }
  func.func @transform_3(%arg0: i32) -> (i32, i32) {
    %c0_i32 = arith.constant 0 : i32
    %c0_i32_0 = arith.constant 0 : i32
    %c0_i32_1 = arith.constant 0 : i32
    return %c0_i32, %c0_i32_0 : i32, i32
  }
  func.func @transform_4(%arg0: i32) -> (i32, i32) {
    %c0_i32 = arith.constant 0 : i32
    %c0_i32_0 = arith.constant 0 : i32
    %c0_i32_1 = arith.constant 0 : i32
    return %c0_i32, %c0_i32_0 : i32, i32
  }
  func.func @transform_5(%arg0: i32) -> (i32, i32) {
    %c0_i32 = arith.constant 0 : i32
    %c0_i32_0 = arith.constant 0 : i32
    %c0_i32_1 = arith.constant 0 : i32
    return %c0_i32, %c0_i32_0 : i32, i32
  }
  func.func @transform_6(%arg0: i32) -> (i32, i32) {
    %c0_i32 = arith.constant 0 : i32
    %c0_i32_0 = arith.constant 0 : i32
    %c0_i32_1 = arith.constant 0 : i32
    return %c0_i32, %c0_i32_0 : i32, i32
  }
  func.func @transform_7(%arg0: i32) -> (i32, i32) {
    %c0_i32 = arith.constant 0 : i32
    %c0_i32_0 = arith.constant 0 : i32
    %c0_i32_1 = arith.constant 0 : i32
    return %c0_i32, %c0_i32_0 : i32, i32
  }
  func.func @transform_8(%arg0: i32) -> (i32, i32) {
    %c0_i32 = arith.constant 0 : i32
    %c0_i32_0 = arith.constant 0 : i32
    %c0_i32_1 = arith.constant 0 : i32
    return %c0_i32, %c0_i32_0 : i32, i32
  }
  func.func @transform_9(%arg0: i32) -> (i32, i32) {
    %c0_i32 = arith.constant 0 : i32
    %c0_i32_0 = arith.constant 0 : i32
    %c0_i32_1 = arith.constant 0 : i32
    return %c0_i32, %c0_i32_0 : i32, i32
  }
}

</mosaic_0001>

<bundles_post_ra>
// kernel: advanced_lstm_forward.1
= control target key start
LH: loop header
LB: loop body
LE: loop exit
PB: predicated region body
PF: predicated region fallthrough
CT: control target
= control target key end

     0   :  { %14 = vsyncpa [#allocation7], 0  ;;  %s1914_s0 = inlined_call_operand.vmem [shape: f32[64,16], index: 0, kind: input, shape index: {}]   ;;  %s1915_s1 = inlined_call_operand.vmem [shape: f32[16,128], index: 1, kind: input, shape index: {}]   ;;  %s1916_s2 = inlined_call_operand.hbm [shape: f32[128,128], index: 2, kind: input, shape index: {}]   ;;  %s1917_s3 = inlined_call_operand.vmem [shape: f32[1,128], index: 3, kind: input, shape index: {}]   ;;  %s1918_s4 = inlined_call_operand.hbm [shape: f32[128,128], index: 4, kind: input, shape index: {}]   ;;  %s1919_s5 = inlined_call_operand.hbm [shape: f32[128,128], index: 5, kind: input, shape index: {}]   ;;  %s1920_s6 = inlined_call_operand.vmem [shape: f32[1,128], index: 6, kind: input, shape index: {}]   ;;  %s1921_s7 = inlined_call_operand.hbm [shape: f32[128,128], index: 7, kind: input, shape index: {}]   ;;  %s1922_s8 = inlined_call_operand.vmem [shape: f32[1,128], index: 8, kind: input, shape index: {}]   ;;  %s1923_s9 = inlined_call_operand.vmem [shape: f32[8,128], index: 9, kind: output, shape index: {}]  }
   0x1   :  { %15 = vsyncpa [#allocation9], 0 }
   0x2   :  { %16 = vsyncpa [#allocation12], 0  ;;  %s40_s11 = sshll.u32 %s1918_s4, 4  ;;  %s1281_s12 = smov [#allocation8]   ;;  %s41_s11 = int_to_ptr.hbm [resolvable:$true] %s40_s11 }
   0x3   :  { %s42_s13 = sshll.u32 %s1281_s12, 4  ;;  %s25_s16 = sshll.u32 %s1916_s2, 4  ;;  %s43_s13 = int_to_ptr.vmem [resolvable:$true] %s42_s13  ;;  %s26_s16 = int_to_ptr.hbm [resolvable:$true] %s25_s16 }
   0x4   :  { %s1282_s17 = smov 128   ;;  %s1283_s18 = smov 8  }
   0x5   :  { %48 = dma.hbm_to_vmem [thread:$0]  %s41_s11, 2048, %s43_s13, [#allocation9], %s1282_s17, %s1282_s17, %s1283_s18  }
   0x6   :  { %s1284_s19 = smov [#allocation6]   ;;  %s53_s23 = sshll.u32 %s1919_s5, 4  ;;  %s54_s23 = int_to_ptr.hbm [resolvable:$true] %s53_s23 }
   0x7   :  { %s27_s20 = sshll.u32 %s1284_s19, 4  ;;  %s68_s25 = sshll.u32 %s1921_s7, 4  ;;  %s28_s20 = int_to_ptr.vmem [resolvable:$true] %s27_s20  ;;  %s69_s25 = int_to_ptr.hbm [resolvable:$true] %s68_s25 }
   0x8   :  { %33 = dma.hbm_to_vmem [thread:$0]  %s26_s16, 2048, %s28_s20, [#allocation7], %s1282_s17, %s1282_s17, %s1283_s18  }
   0x9   :  { %s1285_s26 = smov [#allocation10]   ;;  %s1286_s2 = smov [#allocation11]  }
   0xa   :  { %s55_s27 = sshll.u32 %s1285_s26, 4  ;;  %s70_s28 = sshll.u32 %s1286_s2, 4  ;;  %s56_s27 = int_to_ptr.vmem [resolvable:$true] %s55_s27  ;;  %s71_s28 = int_to_ptr.vmem [resolvable:$true] %s70_s28 }
   0xb   :  { %61 = dma.hbm_to_vmem [thread:$0]  %s54_s23, 2048, %s56_s27, [#allocation9], %s1282_s17, %s1282_s17, %s1283_s18  }
   0xc   :  { %76 = dma.hbm_to_vmem [thread:$0]  %s69_s25, 2048, %s71_s28, [#allocation12], %s1282_s17, %s1282_s17, %s1283_s18  }
   0xd   :  { %1275 = dma.done.wait [#allocation7], 2048  }
   0xe   :  { %1276 = vsyncadd [#allocation7], 4294965248 }
   0xf   :  { %1277 = dma.done.wait [#allocation9], 4096  }
  0x10   :  { %1278 = vsyncadd [#allocation9], 4294963200 }
  0x11   :  { %1279 = dma.done.wait [#allocation12], 2048  }
  0x12   :  { %1280 = vsyncadd [#allocation12], 4294965248  ;;  %v1354_v0 = vld [vmem:[#allocation6 + $0x78] sm:$0xff]  ;;  %v1356_v1 = vld [vmem:[#allocation6 + $0x70] sm:$0xff]  ;;  %vm143_vm0 = vcmask 130048   ;;  %v1287_v19 = vmov 0.0   ;;  %v103_v20 = vlaneseq }
  0x13   :  { %219 = vmatpush.msra.mxu1 %v1354_v0  ;;  %264 = vmatpush.msra.mxu2 %v1354_v0  ;;  %v1360_v2 = vld [vmem:[#allocation6 + $0x68] sm:$0xff]  ;;  %v1365_v3 = vld [vmem:[#allocation6 + $0x60] sm:$0xff]  ;;  %v1378_v7 = vld [vmem:[#allocation6 + $0x58] sm:$0xff]  ;;  %v1288_v25 = vmov 0.5   ;;  %s1290_s13 = smov 96   ;;  %s1291_s14 = smov 64  }
  0x14   :  { %310 = vmatpush.msra.mxu3 %v1354_v0  ;;  %v114_v4 = vld [vmem:[%s1915_s1 + $0x8] sm:$0xff]  ;;  %v113_v5 = vld [vmem:[%s1915_s1] sm:$0xff]  ;;  %v1383_v8 = vld [vmem:[#allocation6 + $0x50] sm:$0xff]  ;;  %v1525_v21 = vand.u32 127, %v103_v20 }
  0x15   :  { %220 = vmatpush.msra.mxu1 %v1356_v1  ;;  %265 = vmatpush.msra.mxu2 %v1356_v1  ;;  %v132_v6 = vld [vmem:[%s1914_s0] sm:$0xff]  ;;  %v1389_v9 = vld [vmem:[#allocation6 + $0x48] sm:$0xff]  ;;  %v1401_v11 = vld [vmem:[#allocation6 + $0x38] sm:$0xff] }
  0x16   :  { %311 = vmatpush.msra.mxu3 %v1356_v1  ;;  %182 = vmatpush.msra.mxu0 %v114_v4  ;;  %v1395_v10 = vld [vmem:[#allocation6 + $0x40] sm:$0xff]  ;;  %v1407_v12 = vld [vmem:[#allocation6 + $0x30] sm:$0xff]  ;;  %v1413_v13 = vld [vmem:[#allocation6 + $0x28] sm:$0xff]  ;;  %vm105_vm1 = vcmp.ge.s32.totalorder %v1525_v21, 64  ;;  %vm106_vm2 = vcmp.lt.s32.totalorder %v1525_v21, 96  ;;  %vm110_vm4 = vcmp.lt.s32.totalorder %v1525_v21, 32 }
  0x17   :  { %221 = vmatpush.msra.mxu1 %v1360_v2  ;;  %266 = vmatpush.msra.mxu2 %v1360_v2  ;;  %v1419_v14 = vld [vmem:[#allocation6 + $0x20] sm:$0xff]  ;;  %v1425_v15 = vld [vmem:[#allocation6 + $0x18] sm:$0xff]  ;;  %v1431_v16 = vld [vmem:[#allocation6 + $0x10] sm:$0xff]  ;;  %v1551_v43 = vsel %vm110_vm4, 1.0, %v1287_v19  ;;  %vm1066_vm5 = vcmp.lt.s32.totalorder %v1525_v21, 4 }
  0x18   :  { %312 = vmatpush.msra.mxu3 %v1360_v2  ;;  %183 = vmatpush.msra.mxu0 %v113_v5  ;;  %v1437_v17 = vld [vmem:[#allocation6 + $0x8] sm:$0xff]  ;;  %v1443_v18 = vld [vmem:[#allocation6] sm:$0xff]  ;;  %vm107_vm3 = vmand %vm105_vm1, %vm106_vm2 }
  0x19   :  { %222 = vmatpush.msra.mxu1 %v1365_v3  ;;  %1089 = vmatmul.msk.f32.vlgmr.msra.gmra.mxu0 %vm143_vm0, %v132_v6  ;;  %v1530_v22 = vld [vmem:[%s1917_s3] ss:$0 sm:$0xff]  ;;  %v1535_v26 = vsel %vm107_vm3, 1.0, %v1288_v25  ;;  %v1538_v31 = vsel %vm107_vm3, 0.0, %v1288_v25  ;;  %s1289_s3 = smov 32   ;;  %v133_v34 = vld [vmem:[%s1914_s0 + $0x8] sm:$0xff] }
  0x1a   :  { %267 = vmatpush.msra.mxu2 %v1365_v3  ;;  %313 = vmatpush.msra.mxu3 %v1365_v3  ;;  %v134_v53 = vld [vmem:[%s1914_s0 + $0x10] sm:$0xff] }
  0x1b   :  { %223 = vmatpush.msra.mxu1 %v1378_v7  ;;  %494 = vmatpush.msrb.mxu0 %v1354_v0 }
  0x1c   :  { %268 = vmatpush.msra.mxu2 %v1378_v7  ;;  %314 = vmatpush.msra.mxu3 %v1378_v7 }
  0x1d   :  { %224 = vmatpush.msra.mxu1 %v1383_v8  ;;  %495 = vmatpush.msrb.mxu0 %v1356_v1 }
  0x1e   :  { %269 = vmatpush.msra.mxu2 %v1383_v8  ;;  %315 = vmatpush.msra.mxu3 %v1383_v8 }
  0x1f   :  { %225 = vmatpush.msra.mxu1 %v1389_v9  ;;  %496 = vmatpush.msrb.mxu0 %v1360_v2 }
  0x20   :  { %270 = vmatpush.msra.mxu2 %v1389_v9  ;;  %316 = vmatpush.msra.mxu3 %v1389_v9 }
  0x21   :  { %226 = vmatpush.msra.mxu1 %v1395_v10  ;;  %497 = vmatpush.msrb.mxu0 %v1365_v3 }
  0x22   :  { %271 = vmatpush.msra.mxu2 %v1395_v10  ;;  %317 = vmatpush.msra.mxu3 %v1395_v10 }
  0x23   :  { %227 = vmatpush.msra.mxu1 %v1401_v11  ;;  %498 = vmatpush.msrb.mxu0 %v1378_v7 }
  0x24   :  { %272 = vmatpush.msra.mxu2 %v1401_v11  ;;  %318 = vmatpush.msra.mxu3 %v1401_v11 }
  0x25   :  { %228 = vmatpush.msra.mxu1 %v1407_v12  ;;  %499 = vmatpush.msrb.mxu0 %v1383_v8 }
  0x26   :  { %273 = vmatpush.msra.mxu2 %v1407_v12  ;;  %319 = vmatpush.msra.mxu3 %v1407_v12 }
  0x27   :  { %229 = vmatpush.msra.mxu1 %v1413_v13  ;;  %500 = vmatpush.msrb.mxu0 %v1389_v9 }
  0x28   :  { %274 = vmatpush.msra.mxu2 %v1413_v13  ;;  %320 = vmatpush.msra.mxu3 %v1413_v13 }
  0x29   :  { %230 = vmatpush.msra.mxu1 %v1419_v14  ;;  %501 = vmatpush.msrb.mxu0 %v1395_v10 }
  0x2a   :  { %275 = vmatpush.msra.mxu2 %v1419_v14  ;;  %321 = vmatpush.msra.mxu3 %v1419_v14 }
  0x2b   :  { %231 = vmatpush.msra.mxu1 %v1425_v15  ;;  %502 = vmatpush.msrb.mxu0 %v1401_v11 }
  0x2c   :  { %276 = vmatpush.msra.mxu2 %v1425_v15  ;;  %322 = vmatpush.msra.mxu3 %v1425_v15 }
  0x2d   :  { %232 = vmatpush.msra.mxu1 %v1431_v16  ;;  %503 = vmatpush.msrb.mxu0 %v1407_v12 }
  0x2e   :  { %277 = vmatpush.msra.mxu2 %v1431_v16  ;;  %323 = vmatpush.msra.mxu3 %v1431_v16 }
  0x2f   :  { %233 = vmatpush.msra.mxu1 %v1437_v17  ;;  %504 = vmatpush.msrb.mxu0 %v1413_v13 }
  0x30   :  { %278 = vmatpush.msra.mxu2 %v1437_v17  ;;  %324 = vmatpush.msra.mxu3 %v1437_v17 }
  0x31   :  { %234 = vmatpush.msra.mxu1 %v1443_v18  ;;  %505 = vmatpush.msrb.mxu0 %v1419_v14 }
  0x32   :  { %235 = vmatmul.f32.vlgmr.msra.gmra.mxu1 %v1287_v19  ;;  %279 = vmatpush.msra.mxu2 %v1443_v18 }
  0x33   :  { %325 = vmatpush.msra.mxu3 %v1443_v18  ;;  %356 = vmatpush.msrb.mxu1 %v1354_v0 }
  0x34   :  { %402 = vmatpush.msrb.mxu2 %v1354_v0  ;;  %506 = vmatpush.msrb.mxu0 %v1425_v15 }
  0x35   :  { %448 = vmatpush.msrb.mxu3 %v1354_v0  ;;  %357 = vmatpush.msrb.mxu1 %v1356_v1 }
  0x36   :  { %403 = vmatpush.msrb.mxu2 %v1356_v1  ;;  %507 = vmatpush.msrb.mxu0 %v1431_v16 }
  0x37   :  { %449 = vmatpush.msrb.mxu3 %v1356_v1  ;;  %358 = vmatpush.msrb.mxu1 %v1360_v2 }
  0x38   :  { %404 = vmatpush.msrb.mxu2 %v1360_v2  ;;  %508 = vmatpush.msrb.mxu0 %v1437_v17 }
  0x39   :  { %450 = vmatpush.msrb.mxu3 %v1360_v2  ;;  %359 = vmatpush.msrb.mxu1 %v1365_v3 }
  0x3a   :  { %405 = vmatpush.msrb.mxu2 %v1365_v3  ;;  %509 = vmatpush.msrb.mxu0 %v1443_v18 }
  0x3b   :  { %451 = vmatpush.msrb.mxu3 %v1365_v3  ;;  %360 = vmatpush.msrb.mxu1 %v1378_v7 }
  0x3c   :  { %406 = vmatpush.msrb.mxu2 %v1378_v7  ;;  %1090 = vmatmul.msk.f32.gmra.mxu0 %vm143_vm0, %v133_v34  ;;  %v596_v34 = vld [vmem:[#allocation8 + $0x68] sm:$0xff] }
  0x3d   :  { %452 = vmatpush.msrb.mxu3 %v1378_v7  ;;  %361 = vmatpush.msrb.mxu1 %v1383_v8 }
  0x3e   :  { %407 = vmatpush.msrb.mxu2 %v1383_v8 }
  0x3f   :  { %453 = vmatpush.msrb.mxu3 %v1383_v8  ;;  %362 = vmatpush.msrb.mxu1 %v1389_v9 }
  0x40   :  { %408 = vmatpush.msrb.mxu2 %v1389_v9 }
  0x41   :  { %454 = vmatpush.msrb.mxu3 %v1389_v9  ;;  %363 = vmatpush.msrb.mxu1 %v1395_v10 }
  0x42   :  { %409 = vmatpush.msrb.mxu2 %v1395_v10 }
  0x43   :  { %455 = vmatpush.msrb.mxu3 %v1395_v10  ;;  %364 = vmatpush.msrb.mxu1 %v1401_v11 }
  0x44   :  { %410 = vmatpush.msrb.mxu2 %v1401_v11  ;;  %1091 = vmatmul.msk.f32.gmra.mxu0 %vm143_vm0, %v134_v53 }
  0x45   :  { %456 = vmatpush.msrb.mxu3 %v1401_v11  ;;  %365 = vmatpush.msrb.mxu1 %v1407_v12 }
  0x46   :  { %411 = vmatpush.msrb.mxu2 %v1407_v12 }
  0x47   :  { %457 = vmatpush.msrb.mxu3 %v1407_v12  ;;  %366 = vmatpush.msrb.mxu1 %v1413_v13 }
  0x48   :  { %412 = vmatpush.msrb.mxu2 %v1413_v13 }
  0x49   :  { %458 = vmatpush.msrb.mxu3 %v1413_v13  ;;  %367 = vmatpush.msrb.mxu1 %v1419_v14 }
  0x4a   :  { %413 = vmatpush.msrb.mxu2 %v1419_v14 }
  0x4b   :  { %459 = vmatpush.msrb.mxu3 %v1419_v14  ;;  %368 = vmatpush.msrb.mxu1 %v1425_v15 }
  0x4c   :  { %414 = vmatpush.msrb.mxu2 %v1425_v15 }
  0x4d   :  { %460 = vmatpush.msrb.mxu3 %v1425_v15  ;;  %369 = vmatpush.msrb.mxu1 %v1431_v16 }
  0x4e   :  { %415 = vmatpush.msrb.mxu2 %v1431_v16 }
  0x4f   :  { %461 = vmatpush.msrb.mxu3 %v1431_v16  ;;  %370 = vmatpush.msrb.mxu1 %v1437_v17 }
  0x50   :  { %416 = vmatpush.msrb.mxu2 %v1437_v17 }
  0x51   :  { %462 = vmatpush.msrb.mxu3 %v1437_v17  ;;  %371 = vmatpush.msrb.mxu1 %v1443_v18 }
  0x52   :  { %417 = vmatpush.msrb.mxu2 %v1443_v18 }
  0x53   :  { %463 = vmatpush.msrb.mxu3 %v1443_v18  ;;  %540 = vmatpush.msra.mxu1 %v1354_v0 }
  0x55   :  { %541 = vmatpush.msra.mxu1 %v1356_v1 }
  0x57   :  { %542 = vmatpush.msra.mxu1 %v1360_v2 }
  0x59   :  { %543 = vmatpush.msra.mxu1 %v1365_v3 }
  0x5b   :  { %544 = vmatpush.msra.mxu1 %v1378_v7 }
  0x5d   :  { %545 = vmatpush.msra.mxu1 %v1383_v8  ;;  %v135_v8 = vld [vmem:[%s1914_s0 + $0x18] sm:$0xff] }
  0x5e   :  { %1092 = vmatmul.msk.f32.gmra.mxu0 %vm143_vm0, %v135_v8  ;;  %v1640_v8 = vld [vmem:[#allocation10 + $0x58] sm:$0xff] }
  0x5f   :  { %546 = vmatpush.msra.mxu1 %v1389_v9 }
  0x61   :  { %547 = vmatpush.msra.mxu1 %v1395_v10 }
  0x63   :  { %548 = vmatpush.msra.mxu1 %v1401_v11 }
  0x65   :  { %549 = vmatpush.msra.mxu1 %v1407_v12 }
  0x67   :  { %550 = vmatpush.msra.mxu1 %v1413_v13 }
  0x69   :  { %551 = vmatpush.msra.mxu1 %v1419_v14 }
  0x6b   :  { %552 = vmatpush.msra.mxu1 %v1425_v15 }
  0x6d   :  { %553 = vmatpush.msra.mxu1 %v1431_v16 }
  0x6f   :  { %554 = vmatpush.msra.mxu1 %v1437_v17 }
  0x71   :  { %555 = vmatpush.msra.mxu1 %v1443_v18 }
  0x96   :  { %v185_v23 = vpop.f32.mrf.mxu0 }
  0x97   :  { %v186_v24 = vadd.f32 %v1530_v22, %v185_v23 }
  0xaf   :  { %v236_v27 = vpop.f32.mrf.mxu1 }
  0xb0   :  { %v239_v28 = vadd.f32 %v236_v27, %v186_v24 }
  0xb2   :  { %v240_v29 = vmul.f32 %v239_v28, %v1535_v26 }
  0xb4   :  { %1111 = vtanh.f32 %v240_v29 }
  0xb9   :  { %v188_v45 = vpop.f32.mrf.mxu0 }
  0xba   :  { %v1112_v30 = vpop.eup %1111  ;;  %v189_v46 = vadd.f32 %v1530_v22, %v188_v45  ;;  %v587_v45 = vld [vmem:[#allocation8 + $0x20] sm:$0xff] }
  0xbb   :  { %v242_v32 = vmul.f32 %v1112_v30, %v1535_v26 }
  0xbd   :  { %v243_v33 = vadd.f32 %v242_v32, %v1538_v31  ;;  %v598_v32 = vld [vmem:[#allocation8 + $0x78] sm:$0xff] }
  0xbf   :  { %248 = vrot.lane.b32.xlu1 %v243_v33, %s1289_s3  ;;  %244 = vrot.lane.b32.xlu0 %v243_v33, %s1290_s13 }
  0xc1   :  { %v191_v0 = vpop.f32.mrf.mxu0 }
  0xc2   :  { %v192_v1 = vadd.f32 %v1530_v22, %v191_v0 }
  0xc7   :  { %246 = vrot.lane.b32.xlu0 %v243_v33, %s1291_s14 }
  0xdb   :  { %v194_v20 = vpop.f32.mrf.mxu0 }
  0xdc   :  { %v195_v23 = vadd.f32 %v1530_v22, %v194_v20  ;;  %v1697_v20 = vld [vmem:[#allocation10 + $0x8] sm:$0xff] }
 0x131   :  { %v245_v35 = vpop.permute.xlu0 %244  ;;  %v249_v41 = vpop.permute.xlu1 %248 }
 0x132   :  { %v251_v37 = vmul.f32 0.0, %v245_v35  ;;  %v595_v35 = vld [vmem:[#allocation8 + $0x60] sm:$0xff] }
 0x139   :  { %v247_v36 = vpop.permute.xlu0 %246 }
 0x13a   :  { %v252_v38 = vmul.f32 %v247_v36, %v243_v33  ;;  %v597_v33 = vld [vmem:[#allocation8 + $0x70] sm:$0xff]  ;;  %v594_v36 = vld [vmem:[#allocation8 + $0x58] sm:$0xff] }
 0x13c   :  { %v253_v39 = vadd.f32 %v252_v38, %v251_v37  ;;  %v593_v37 = vld [vmem:[#allocation8 + $0x50] sm:$0xff]  ;;  %v592_v38 = vld [vmem:[#allocation8 + $0x48] sm:$0xff] }
 0x13e   :  { %1113 = vtanh.f32 %v253_v39  ;;  %v256_v55 = vmul.f32 %v1551_v43, %v253_v39  ;;  %v591_v39 = vld [vmem:[#allocation8 + $0x40] sm:$0xff] }
 0x144   :  { %v1114_v40 = vpop.eup %1113 }
 0x145   :  { %v255_v42 = vmul.f32 %v1114_v40, %v249_v41  ;;  %v590_v40 = vld [vmem:[#allocation8 + $0x38] sm:$0xff]  ;;  %v589_v41 = vld [vmem:[#allocation8 + $0x30] sm:$0xff] }
 0x147   :  { %v1554_v44 = vmul.f32 %v1551_v43, %v255_v42  ;;  %v588_v42 = vld [vmem:[#allocation8 + $0x28] sm:$0xff] }
 0x149   :  { %280 = vmatmul.f32.vlgmr.msra.gmra.mxu2 %v1554_v44 }
 0x14a   :  { %627 = vmatpush.msra.mxu2 %v598_v32 }
 0x14c   :  { %628 = vmatpush.msra.mxu2 %v597_v33 }
 0x14e   :  { %629 = vmatpush.msra.mxu2 %v596_v34 }
 0x150   :  { %630 = vmatpush.msra.mxu2 %v595_v35 }
 0x152   :  { %631 = vmatpush.msra.mxu2 %v594_v36 }
 0x154   :  { %632 = vmatpush.msra.mxu2 %v593_v37 }
 0x156   :  { %633 = vmatpush.msra.mxu2 %v592_v38 }
 0x158   :  { %634 = vmatpush.msra.mxu2 %v591_v39  ;;  %v1760_v39 = vld [vmem:[%s1920_s6] ss:$0 sm:$0xff] }
 0x15a   :  { %635 = vmatpush.msra.mxu2 %v590_v40 }
 0x15c   :  { %636 = vmatpush.msra.mxu2 %v589_v41 }
 0x15e   :  { %637 = vmatpush.msra.mxu2 %v588_v42 }
 0x160   :  { %638 = vmatpush.msra.mxu2 %v587_v45 }
 0x1cc   :  { %v281_v47 = vpop.f32.mrf.mxu2 }
 0x1cd   :  { %v284_v48 = vadd.f32 %v281_v47, %v189_v46  ;;  %v586_v46 = vld [vmem:[#allocation8 + $0x18] sm:$0xff]  ;;  %v585_v47 = vld [vmem:[#allocation8 + $0x10] sm:$0xff] }
 0x1ce   :  { %639 = vmatpush.msra.mxu2 %v586_v46 }
 0x1cf   :  { %v285_v49 = vmul.f32 %v284_v48, %v1535_v26  ;;  %v136_v48 = vld [vmem:[%s1914_s0 + $0x20] sm:$0xff] }
 0x1d0   :  { %1093 = vmatmul.msk.f32.gmra.mxu0 %vm143_vm0, %v136_v48  ;;  %640 = vmatpush.msra.mxu2 %v585_v47 }
 0x1d1   :  { %1115 = vtanh.f32 %v285_v49  ;;  %v584_v49 = vld [vmem:[#allocation8 + $0x8] sm:$0xff] }
 0x1d2   :  { %641 = vmatpush.msra.mxu2 %v584_v49 }
 0x1d7   :  { %v1116_v50 = vpop.eup %1115 }
 0x1d8   :  { %v287_v51 = vmul.f32 %v1116_v50, %v1535_v26  ;;  %v583_v50 = vld [vmem:[#allocation8] sm:$0xff] }
 0x1d9   :  { %642 = vmatpush.msra.mxu2 %v583_v50 }
 0x1da   :  { %v288_v52 = vadd.f32 %v287_v51, %v1538_v31 }
 0x1dc   :  { %291 = vrot.lane.b32.xlu2 %v288_v52, %s1291_s14  ;;  %289 = vrot.lane.b32.xlu1 %v288_v52, %s1290_s13 }
 0x1e4   :  { %293 = vrot.lane.b32.xlu2 %v288_v52, %s1289_s3 }
 0x236   :  { %v292_v54 = vpop.permute.xlu2 %291 }
 0x237   :  { %v297_v57 = vmul.f32 %v292_v54, %v288_v52 }
 0x23e   :  { %v294_v61 = vpop.permute.xlu2 %293 }
 0x24e   :  { %v290_v56 = vpop.permute.xlu1 %289 }
 0x24f   :  { %v296_v58 = vmul.f32 %v290_v56, %v256_v55 }
 0x251   :  { %v298_v59 = vadd.f32 %v297_v57, %v296_v58 }
 0x253   :  { %1117 = vtanh.f32 %v298_v59  ;;  %v301_v10 = vmul.f32 %v1551_v43, %v298_v59 }
 0x259   :  { %v1118_v60 = vpop.eup %1117 }
 0x25a   :  { %v300_v62 = vmul.f32 %v1118_v60, %v294_v61  ;;  %v197_v61 = vpop.f32.mrf.mxu0 }
 0x25c   :  { %v1570_v63 = vmul.f32 %v1551_v43, %v300_v62  ;;  %v198_v62 = vadd.f32 %v1530_v22, %v197_v61 }
 0x25e   :  { %326 = vmatmul.f32.vlgmr.msra.gmra.mxu3 %v1570_v63 }
 0x2e1   :  { %v327_v2 = vpop.f32.mrf.mxu3 }
 0x2e2   :  { %v330_v3 = vadd.f32 %v327_v2, %v192_v1 }
 0x2e4   :  { %v331_v4 = vmul.f32 %v330_v3, %v1535_v26 }
 0x2e6   :  { %1119 = vtanh.f32 %v331_v4 }
 0x2ec   :  { %v1120_v5 = vpop.eup %1119 }
 0x2ed   :  { %v333_v6 = vmul.f32 %v1120_v5, %v1535_v26 }
 0x2ef   :  { %v334_v7 = vadd.f32 %v333_v6, %v1538_v31  ;;  %v1622_v6 = vld [vmem:[#allocation10 + $0x68] sm:$0xff] }
 0x2f1   :  { %339 = vrot.lane.b32.xlu2 %v334_v7, %s1289_s3  ;;  %337 = vrot.lane.b32.xlu1 %v334_v7, %s1291_s14 }
 0x2f2   :  { %335 = vrot.lane.b32.xlu0 %v334_v7, %s1290_s13 }
 0x34b   :  { %v340_v16 = vpop.permute.xlu2 %339 }
 0x363   :  { %v338_v9 = vpop.permute.xlu1 %337 }
 0x364   :  { %v343_v11 = vmul.f32 %v338_v9, %v334_v7  ;;  %v336_v12 = vpop.permute.xlu0 %335  ;;  %v1628_v7 = vld [vmem:[#allocation10 + $0x60] sm:$0xff]  ;;  %v1644_v9 = vld [vmem:[#allocation10 + $0x50] sm:$0xff] }
 0x365   :  { %v342_v13 = vmul.f32 %v336_v12, %v301_v10  ;;  %v1650_v10 = vld [vmem:[#allocation10 + $0x48] sm:$0xff]  ;;  %v1658_v12 = vld [vmem:[#allocation10 + $0x38] sm:$0xff] }
 0x367   :  { %v344_v14 = vadd.f32 %v343_v11, %v342_v13  ;;  %v1655_v11 = vld [vmem:[#allocation10 + $0x40] sm:$0xff]  ;;  %v1664_v13 = vld [vmem:[#allocation10 + $0x30] sm:$0xff] }
 0x369   :  { %1121 = vtanh.f32 %v344_v14  ;;  %v347_v52 = vmul.f32 %v1551_v43, %v344_v14  ;;  %v1670_v14 = vld [vmem:[#allocation10 + $0x28] sm:$0xff] }
 0x36f   :  { %v1122_v15 = vpop.eup %1121 }
 0x370   :  { %v346_v17 = vmul.f32 %v1122_v15, %v340_v16  ;;  %v1676_v15 = vld [vmem:[#allocation10 + $0x20] sm:$0xff]  ;;  %v1686_v16 = vld [vmem:[#allocation10 + $0x18] sm:$0xff] }
 0x372   :  { %v349_v18 = vmul.f32 %v1551_v43, %v346_v17  ;;  %v1688_v17 = vld [vmem:[#allocation10 + $0x10] sm:$0xff] }
 0x374   :  { %372 = vmatmul.f32.vlgmr.msrb.gmra.mxu1 %v349_v18 }
 0x3f1   :  { %v373_v24 = vpop.f32.mrf.mxu1 }
 0x3f2   :  { %v376_v25 = vadd.f32 %v373_v24, %v195_v23  ;;  %v1703_v23 = vld [vmem:[#allocation10] sm:$0xff] }
 0x3f4   :  { %v377_v27 = vmul.f32 %v376_v25, %v1535_v26 }
 0x3f6   :  { %1123 = vtanh.f32 %v377_v27 }
 0x3fc   :  { %v1124_v28 = vpop.eup %1123 }
 0x3fd   :  { %v379_v29 = vmul.f32 %v1124_v28, %v1535_v26 }
 0x3ff   :  { %v380_v30 = vadd.f32 %v379_v29, %v1538_v31 }
 0x401   :  { %385 = vrot.lane.b32.xlu2 %v380_v30, %s1289_s3  ;;  %383 = vrot.lane.b32.xlu1 %v380_v30, %s1291_s14 }
 0x402   :  { %381 = vrot.lane.b32.xlu0 %v380_v30, %s1290_s13 }
 0x45b   :  { %v386_v58 = vpop.permute.xlu2 %385 }
 0x473   :  { %v384_v51 = vpop.permute.xlu1 %383 }
 0x474   :  { %v389_v53 = vmul.f32 %v384_v51, %v380_v30  ;;  %v382_v54 = vpop.permute.xlu0 %381 }
 0x475   :  { %v388_v55 = vmul.f32 %v382_v54, %v347_v52  ;;  %v138_v54 = vld [vmem:[%s1914_s0 + $0x30] sm:$0xff] }
 0x477   :  { %v1598_v56 = vadd.f32 %v389_v53, %v388_v55  ;;  %v139_v55 = vld [vmem:[%s1914_s0 + $0x38] sm:$0xff] }
 0x479   :  { %1125 = vtanh.f32 %v1598_v56  ;;  %v393_v25 = vmul.f32 %v1551_v43, %v1598_v56 }
 0x47f   :  { %v1126_v57 = vpop.eup %1125 }
 0x480   :  { %v392_v59 = vmul.f32 %v1126_v57, %v386_v58 }
 0x482   :  { %v395_v60 = vmul.f32 %v1551_v43, %v392_v59 }
 0x484   :  { %418 = vmatmul.f32.vlgmr.msrb.gmra.mxu2 %v395_v60 }
 0x48c   :  { %643 = vmatmul.f32.vlgmr.msra.gmra.mxu2 %v1554_v44  ;;  %v1616_v44 = vld [vmem:[#allocation10 + $0x78] sm:$0xff] }
 0x48d   :  { %679 = vmatpush.msra.mxu3 %v1616_v44  ;;  %723 = vmatpush.msra.mxu0 %v1616_v44 }
 0x48e   :  { %766 = vmatpush.msrb.mxu1 %v1616_v44  ;;  %938 = vmatpush.msrb.mxu2 %v1616_v44 }
 0x494   :  { %646 = vmatmul.f32.gmra.mxu2 %v1570_v63  ;;  %v1618_v63 = vld [vmem:[#allocation10 + $0x70] sm:$0xff] }
 0x495   :  { %680 = vmatpush.msra.mxu3 %v1618_v63  ;;  %724 = vmatpush.msra.mxu0 %v1618_v63 }
 0x496   :  { %767 = vmatpush.msrb.mxu1 %v1618_v63  ;;  %939 = vmatpush.msrb.mxu2 %v1618_v63 }
 0x497   :  { %681 = vmatpush.msra.mxu3 %v1622_v6  ;;  %725 = vmatpush.msra.mxu0 %v1622_v6 }
 0x498   :  { %768 = vmatpush.msrb.mxu1 %v1622_v6  ;;  %940 = vmatpush.msrb.mxu2 %v1622_v6 }
 0x499   :  { %682 = vmatpush.msra.mxu3 %v1628_v7  ;;  %726 = vmatpush.msra.mxu0 %v1628_v7 }
 0x49a   :  { %769 = vmatpush.msrb.mxu1 %v1628_v7  ;;  %941 = vmatpush.msrb.mxu2 %v1628_v7 }
 0x49b   :  { %683 = vmatpush.msra.mxu3 %v1640_v8  ;;  %727 = vmatpush.msra.mxu0 %v1640_v8 }
 0x49c   :  { %649 = vmatmul.f32.gmra.mxu2 %v349_v18  ;;  %770 = vmatpush.msrb.mxu1 %v1640_v8  ;;  %v137_v18 = vld [vmem:[%s1914_s0 + $0x28] sm:$0xff] }
 0x49d   :  { %942 = vmatpush.msrb.mxu2 %v1640_v8  ;;  %684 = vmatpush.msra.mxu3 %v1644_v9 }
 0x49e   :  { %728 = vmatpush.msra.mxu0 %v1644_v9  ;;  %771 = vmatpush.msrb.mxu1 %v1644_v9 }
 0x49f   :  { %943 = vmatpush.msrb.mxu2 %v1644_v9  ;;  %685 = vmatpush.msra.mxu3 %v1650_v10 }
 0x4a0   :  { %729 = vmatpush.msra.mxu0 %v1650_v10  ;;  %772 = vmatpush.msrb.mxu1 %v1650_v10 }
 0x4a1   :  { %944 = vmatpush.msrb.mxu2 %v1650_v10  ;;  %686 = vmatpush.msra.mxu3 %v1655_v11 }
 0x4a2   :  { %730 = vmatpush.msra.mxu0 %v1655_v11  ;;  %773 = vmatpush.msrb.mxu1 %v1655_v11 }
 0x4a3   :  { %945 = vmatpush.msrb.mxu2 %v1655_v11  ;;  %687 = vmatpush.msra.mxu3 %v1658_v12 }
 0x4a4   :  { %652 = vmatmul.f32.gmra.mxu2 %v395_v60  ;;  %731 = vmatpush.msra.mxu0 %v1658_v12 }
 0x4a5   :  { %774 = vmatpush.msrb.mxu1 %v1658_v12  ;;  %946 = vmatpush.msrb.mxu2 %v1658_v12 }
 0x4a6   :  { %688 = vmatpush.msra.mxu3 %v1664_v13  ;;  %732 = vmatpush.msra.mxu0 %v1664_v13 }
 0x4a7   :  { %775 = vmatpush.msrb.mxu1 %v1664_v13  ;;  %947 = vmatpush.msrb.mxu2 %v1664_v13 }
 0x4a8   :  { %689 = vmatpush.msra.mxu3 %v1670_v14  ;;  %733 = vmatpush.msra.mxu0 %v1670_v14 }
 0x4a9   :  { %776 = vmatpush.msrb.mxu1 %v1670_v14  ;;  %948 = vmatpush.msrb.mxu2 %v1670_v14 }
 0x4aa   :  { %690 = vmatpush.msra.mxu3 %v1676_v15  ;;  %734 = vmatpush.msra.mxu0 %v1676_v15 }
 0x4ab   :  { %777 = vmatpush.msrb.mxu1 %v1676_v15  ;;  %949 = vmatpush.msrb.mxu2 %v1676_v15 }
 0x4ac   :  { %691 = vmatpush.msra.mxu3 %v1686_v16  ;;  %1094 = vmatmul.msk.f32.gmra.mxu0 %vm143_vm0, %v137_v18 }
 0x4ad   :  { %735 = vmatpush.msra.mxu0 %v1686_v16  ;;  %778 = vmatpush.msrb.mxu1 %v1686_v16 }
 0x4ae   :  { %692 = vmatpush.msra.mxu3 %v1688_v17  ;;  %950 = vmatpush.msrb.mxu2 %v1686_v16 }
 0x4af   :  { %736 = vmatpush.msra.mxu0 %v1688_v17  ;;  %779 = vmatpush.msrb.mxu1 %v1688_v17 }
 0x4b0   :  { %693 = vmatpush.msra.mxu3 %v1697_v20  ;;  %951 = vmatpush.msrb.mxu2 %v1688_v17 }
 0x4b1   :  { %737 = vmatpush.msra.mxu0 %v1697_v20  ;;  %780 = vmatpush.msrb.mxu1 %v1697_v20 }
 0x4b2   :  { %694 = vmatpush.msra.mxu3 %v1703_v23  ;;  %952 = vmatpush.msrb.mxu2 %v1697_v20 }
 0x4b3   :  { %738 = vmatpush.msra.mxu0 %v1703_v23  ;;  %781 = vmatpush.msrb.mxu1 %v1703_v23 }
 0x4b4   :  { %953 = vmatpush.msrb.mxu2 %v1703_v23  ;;  %1095 = vmatmul.msk.f32.gmra.mxu0 %vm143_vm0, %v138_v54 }
 0x4bc   :  { %1096 = vmatmul.msk.f32.gmra.mxu0 %vm143_vm0, %v139_v55 }
 0x507   :  { %v419_v0 = vpop.f32.mrf.mxu2 }
 0x508   :  { %v422_v1 = vadd.f32 %v419_v0, %v198_v62 }
 0x50a   :  { %v423_v2 = vmul.f32 %v422_v1, %v1535_v26 }
 0x50c   :  { %1127 = vtanh.f32 %v423_v2 }
 0x50f   :  { %v644_v41 = vpop.f32.mrf.mxu2 }
 0x510   :  { %v645_v42 = vadd.f32 %v1760_v39, %v644_v41 }
 0x512   :  { %v1128_v3 = vpop.eup %1127 }
 0x513   :  { %v425_v4 = vmul.f32 %v1128_v3, %v1535_v26 }
 0x515   :  { %v1608_v5 = vadd.f32 %v425_v4, %v1538_v31 }
 0x517   :  { %431 = vrot.lane.b32.xlu2 %v1608_v5, %s1289_s3  ;;  %429 = vrot.lane.b32.xlu1 %v1608_v5, %s1291_s14 }
 0x518   :  { %427 = vrot.lane.b32.xlu0 %v1608_v5, %s1290_s13 }
 0x571   :  { %v432_v33 = vpop.permute.xlu2 %431 }
 0x589   :  { %v430_v24 = vpop.permute.xlu1 %429 }
 0x58a   :  { %v435_v27 = vmul.f32 %v430_v24, %v1608_v5  ;;  %v428_v28 = vpop.permute.xlu0 %427 }
 0x58b   :  { %v434_v29 = vmul.f32 %v428_v28, %v393_v25 }
 0x58d   :  { %v1719_v30 = vadd.f32 %v435_v27, %v434_v29 }
 0x58f   :  { %1129 = vtanh.f32 %v1719_v30  ;;  %v439_v56 = vmul.f32 %v1551_v43, %v1719_v30 }
 0x595   :  { %v1130_v32 = vpop.eup %1129 }
 0x596   :  { %v438_v34 = vmul.f32 %v1130_v32, %v432_v33 }
 0x598   :  { %v441_v35 = vmul.f32 %v1551_v43, %v438_v34 }
 0x59a   :  { %464 = vmatmul.f32.vlgmr.msrb.gmra.mxu3 %v441_v35  ;;  %655 = vmatmul.f32.gmra.mxu2 %v441_v35 }
 0x59b   :  { %809 = vmatpush.msrb.mxu3 %v1616_v44 }
 0x59d   :  { %810 = vmatpush.msrb.mxu3 %v1618_v63 }
 0x59f   :  { %811 = vmatpush.msrb.mxu3 %v1622_v6 }
 0x5a1   :  { %812 = vmatpush.msrb.mxu3 %v1628_v7 }
 0x5a2   :  { %695 = vmatmul.f32.vlgmr.msra.gmra.mxu3 %v1287_v19  ;;  %v200_v19 = vpop.f32.mrf.mxu0 }
 0x5a3   :  { %813 = vmatpush.msrb.mxu3 %v1640_v8  ;;  %v201_v36 = vadd.f32 %v1530_v22, %v200_v19 }
 0x5a5   :  { %814 = vmatpush.msrb.mxu3 %v1644_v9 }
 0x5a7   :  { %815 = vmatpush.msrb.mxu3 %v1650_v10 }
 0x5a9   :  { %816 = vmatpush.msrb.mxu3 %v1655_v11 }
 0x5aa   :  { %v203_v30 = vpop.f32.mrf.mxu0 }
 0x5ab   :  { %817 = vmatpush.msrb.mxu3 %v1658_v12  ;;  %v204_v33 = vadd.f32 %v1530_v22, %v203_v30 }
 0x5ad   :  { %818 = vmatpush.msrb.mxu3 %v1664_v13 }
 0x5af   :  { %819 = vmatpush.msrb.mxu3 %v1670_v14 }
 0x5b1   :  { %820 = vmatpush.msrb.mxu3 %v1676_v15 }
 0x5b2   :  { %v1803_v32 = vpop.f32.mrf.mxu0 }
 0x5b3   :  { %821 = vmatpush.msrb.mxu3 %v1686_v16 }
 0x5b5   :  { %822 = vmatpush.msrb.mxu3 %v1688_v17 }
 0x5b7   :  { %823 = vmatpush.msrb.mxu3 %v1697_v20 }
 0x5b9   :  { %824 = vmatpush.msrb.mxu3 %v1703_v23 }
 0x5bb   :  { %981 = vmatpush.msra.mxu3 %v1616_v44 }
 0x5bd   :  { %982 = vmatpush.msra.mxu3 %v1618_v63 }
 0x5bf   :  { %983 = vmatpush.msra.mxu3 %v1622_v6 }
 0x5c1   :  { %984 = vmatpush.msra.mxu3 %v1628_v7 }
 0x5c3   :  { %985 = vmatpush.msra.mxu3 %v1640_v8 }
 0x5c5   :  { %986 = vmatpush.msra.mxu3 %v1644_v9 }
 0x5c7   :  { %987 = vmatpush.msra.mxu3 %v1650_v10 }
 0x5c9   :  { %988 = vmatpush.msra.mxu3 %v1655_v11 }
 0x5cb   :  { %989 = vmatpush.msra.mxu3 %v1658_v12 }
 0x5cd   :  { %990 = vmatpush.msra.mxu3 %v1664_v13 }
 0x5cf   :  { %991 = vmatpush.msra.mxu3 %v1670_v14 }
 0x5d1   :  { %992 = vmatpush.msra.mxu3 %v1676_v15 }
 0x5d3   :  { %993 = vmatpush.msra.mxu3 %v1686_v16 }
 0x5d5   :  { %994 = vmatpush.msra.mxu3 %v1688_v17 }
 0x5d7   :  { %995 = vmatpush.msra.mxu3 %v1697_v20 }
 0x5d9   :  { %996 = vmatpush.msra.mxu3 %v1703_v23 }
 0x61d   :  { %v465_v37 = vpop.f32.mrf.mxu3 }
 0x61e   :  { %v468_v38 = vadd.f32 %v465_v37, %v201_v36  ;;  %v647_v36 = vpop.f32.mrf.mxu2 }
 0x61f   :  { %v648_v37 = vadd.f32 %v1760_v39, %v647_v36 }
 0x620   :  { %v469_v40 = vmul.f32 %v468_v38, %v1535_v26 }
 0x622   :  { %1131 = vtanh.f32 %v469_v40 }
 0x625   :  { %v696_v45 = vpop.f32.mrf.mxu3 }
 0x626   :  { %v699_v46 = vadd.f32 %v696_v45, %v645_v42 }
 0x628   :  { %v1132_v47 = vpop.eup %1131  ;;  %v700_v48 = vmul.f32 %v699_v46, %v1535_v26 }
 0x629   :  { %v471_v49 = vmul.f32 %v1132_v47, %v1535_v26 }
 0x62a   :  { %1133 = vtanh.f32 %v700_v48 }
 0x62b   :  { %v472_v50 = vadd.f32 %v471_v49, %v1538_v31 }
 0x62d   :  { %475 = vrot.lane.b32.xlu1 %v472_v50, %s1291_s14  ;;  %473 = vrot.lane.b32.xlu0 %v472_v50, %s1290_s13 }
 0x630   :  { %v1134_v51 = vpop.eup %1133 }
 0x631   :  { %v702_v52 = vmul.f32 %v1134_v51, %v1535_v26 }
 0x633   :  { %v703_v53 = vadd.f32 %v702_v52, %v1538_v31 }
 0x635   :  { %704 = vrot.lane.b32.xlu2 %v703_v53, %s1290_s13  ;;  %477 = vrot.lane.b32.xlu1 %v472_v50, %s1289_s3 }
 0x636   :  { %706 = vrot.lane.b32.xlu0 %v703_v53, %s1291_s14 }
 0x63d   :  { %708 = vrot.lane.b32.xlu2 %v703_v53, %s1289_s3 }
 0x68f   :  { %v705_v62 = vpop.permute.xlu2 %704 }
 0x690   :  { %v712_v1 = vmul.f32 0.0, %v705_v62 }
 0x697   :  { %v709_v27 = vpop.permute.xlu2 %708 }
 0x69f   :  { %v476_v57 = vpop.permute.xlu1 %475  ;;  %v474_v58 = vpop.permute.xlu0 %473 }
 0x6a0   :  { %v481_v59 = vmul.f32 %v476_v57, %v472_v50  ;;  %v480_v60 = vmul.f32 %v474_v58, %v439_v56 }
 0x6a2   :  { %v482_v61 = vadd.f32 %v481_v59, %v480_v60 }
 0x6a4   :  { %1135 = vtanh.f32 %v482_v61  ;;  %v485_v50 = vmul.f32 %v1551_v43, %v482_v61 }
 0x6a7   :  { %v478_v4 = vpop.permute.xlu1 %477 }
 0x6a8   :  { %v707_v0 = vpop.permute.xlu0 %706 }
 0x6a9   :  { %v713_v2 = vmul.f32 %v707_v0, %v703_v53 }
 0x6aa   :  { %v1136_v3 = vpop.eup %1135 }
 0x6ab   :  { %v484_v5 = vmul.f32 %v1136_v3, %v478_v4  ;;  %v714_v18 = vadd.f32 %v713_v2, %v712_v1 }
 0x6ad   :  { %v487_v24 = vmul.f32 %v1551_v43, %v484_v5  ;;  %1137 = vtanh.f32 %v714_v18  ;;  %v717_v57 = vmul.f32 %v1551_v43, %v714_v18 }
 0x6af   :  { %510 = vmatmul.f32.vlgmr.msrb.gmra.mxu0 %v487_v24  ;;  %658 = vmatmul.f32.gmra.mxu2 %v487_v24 }
 0x6b0   :  { %852 = vmatpush.msrb.mxu0 %v1616_v44 }
 0x6b2   :  { %853 = vmatpush.msrb.mxu0 %v1618_v63 }
 0x6b3   :  { %v1138_v25 = vpop.eup %1137 }
 0x6b4   :  { %v716_v28 = vmul.f32 %v1138_v25, %v709_v27  ;;  %854 = vmatpush.msrb.mxu0 %v1622_v6 }
 0x6b6   :  { %v719_v29 = vmul.f32 %v1551_v43, %v716_v28  ;;  %855 = vmatpush.msrb.mxu0 %v1628_v7 }
 0x6b8   :  { %739 = vmatmul.f32.vlgmr.msra.gmra.mxu0 %v719_v29 }
 0x6b9   :  { %856 = vmatpush.msrb.mxu0 %v1640_v8 }
 0x6bb   :  { %857 = vmatpush.msrb.mxu0 %v1644_v9 }
 0x6bd   :  { %858 = vmatpush.msrb.mxu0 %v1650_v10 }
 0x6bf   :  { %859 = vmatpush.msrb.mxu0 %v1655_v11 }
 0x6c1   :  { %860 = vmatpush.msrb.mxu0 %v1658_v12 }
 0x6c3   :  { %861 = vmatpush.msrb.mxu0 %v1664_v13 }
 0x6c5   :  { %862 = vmatpush.msrb.mxu0 %v1670_v14 }
 0x6c7   :  { %863 = vmatpush.msrb.mxu0 %v1676_v15 }
 0x6c9   :  { %864 = vmatpush.msrb.mxu0 %v1686_v16 }
 0x6cb   :  { %865 = vmatpush.msrb.mxu0 %v1688_v17 }
 0x6cd   :  { %866 = vmatpush.msrb.mxu0 %v1697_v20 }
 0x6cf   :  { %867 = vmatpush.msrb.mxu0 %v1703_v23 }
 0x72c   :  { %v511_v34 = vpop.f32.mrf.mxu0 }
 0x72d   :  { %v514_v35 = vadd.f32 %v511_v34, %v204_v33 }
 0x72f   :  { %v515_v19 = vmul.f32 %v514_v35, %v1535_v26 }
 0x731   :  { %1139 = vtanh.f32 %v515_v19 }
 0x735   :  { %v740_v38 = vpop.f32.mrf.mxu0 }
 0x736   :  { %v743_v40 = vadd.f32 %v740_v38, %v648_v37 }
 0x737   :  { %v1140_v41 = vpop.eup %1139 }
 0x738   :  { %v744_v42 = vmul.f32 %v743_v40, %v1535_v26  ;;  %v517_v45 = vmul.f32 %v1140_v41, %v1535_v26 }
 0x73a   :  { %1141 = vtanh.f32 %v744_v42  ;;  %v518_v46 = vadd.f32 %v517_v45, %v1538_v31 }
 0x73c   :  { %521 = vrot.lane.b32.xlu1 %v518_v46, %s1291_s14  ;;  %519 = vrot.lane.b32.xlu0 %v518_v46, %s1290_s13 }
 0x740   :  { %v1142_v47 = vpop.eup %1141 }
 0x741   :  { %v746_v48 = vmul.f32 %v1142_v47, %v1535_v26 }
 0x743   :  { %v747_v49 = vadd.f32 %v746_v48, %v1538_v31 }
 0x744   :  { %523 = vrot.lane.b32.xlu1 %v518_v46, %s1289_s3 }
 0x745   :  { %750 = vrot.lane.b32.xlu0 %v747_v49, %s1291_s14  ;;  %748 = vrot.lane.b32.xlu2 %v747_v49, %s1290_s13 }
 0x74d   :  { %752 = vrot.lane.b32.xlu2 %v747_v49, %s1289_s3 }
 0x79f   :  { %v749_v56 = vpop.permute.xlu2 %748 }
 0x7a0   :  { %v755_v59 = vmul.f32 %v749_v56, %v717_v57 }
 0x7a7   :  { %v753_v4 = vpop.permute.xlu2 %752 }
 0x7ae   :  { %v522_v51 = vpop.permute.xlu1 %521  ;;  %v520_v52 = vpop.permute.xlu0 %519 }
 0x7af   :  { %v527_v53 = vmul.f32 %v522_v51, %v518_v46  ;;  %v526_v54 = vmul.f32 %v520_v52, %v485_v50 }
 0x7b1   :  { %v1820_v55 = vadd.f32 %v527_v53, %v526_v54 }
 0x7b3   :  { %1143 = vtanh.f32 %v1820_v55 }
 0x7b6   :  { %v524_v0 = vpop.permute.xlu1 %523 }
 0x7b7   :  { %v751_v58 = vpop.permute.xlu0 %750 }
 0x7b8   :  { %v756_v60 = vmul.f32 %v751_v58, %v747_v49 }
 0x7b9   :  { %v1144_v62 = vpop.eup %1143 }
 0x7ba   :  { %v530_v1 = vmul.f32 %v1144_v62, %v524_v0  ;;  %v757_v2 = vadd.f32 %v756_v60, %v755_v59 }
 0x7bc   :  { %v533_v61 = vmul.f32 %v1551_v43, %v530_v1  ;;  %1145 = vtanh.f32 %v757_v2 }
 0x7be   :  { %556 = vmatmul.f32.vlgmr.msra.gmra.mxu1 %v533_v61  ;;  %661 = vmatmul.f32.gmra.mxu2 %v533_v61 }
 0x7bf   :  { %895 = vmatpush.msra.mxu1 %v1616_v44  ;;  %v207_v44 = vadd.f32 %v1530_v22, %v1803_v32 }
 0x7c1   :  { %896 = vmatpush.msra.mxu1 %v1618_v63 }
 0x7c2   :  { %v1146_v3 = vpop.eup %1145 }
 0x7c3   :  { %v759_v5 = vmul.f32 %v1146_v3, %v753_v4  ;;  %897 = vmatpush.msra.mxu1 %v1622_v6 }
 0x7c5   :  { %v762_v18 = vmul.f32 %v1551_v43, %v759_v5  ;;  %898 = vmatpush.msra.mxu1 %v1628_v7  ;;  %v650_v7 = vpop.f32.mrf.mxu2 }
 0x7c7   :  { %782 = vmatmul.f32.vlgmr.msrb.gmra.mxu1 %v762_v18 }
 0x7c8   :  { %899 = vmatpush.msra.mxu1 %v1640_v8  ;;  %v651_v8 = vadd.f32 %v1760_v39, %v650_v7 }
 0x7ca   :  { %900 = vmatpush.msra.mxu1 %v1644_v9 }
 0x7cc   :  { %901 = vmatpush.msra.mxu1 %v1650_v10 }
 0x7cd   :  { %v653_v29 = vpop.f32.mrf.mxu2 }
 0x7ce   :  { %902 = vmatpush.msra.mxu1 %v1655_v11  ;;  %v654_v30 = vadd.f32 %v1760_v39, %v653_v29 }
 0x7d0   :  { %903 = vmatpush.msra.mxu1 %v1658_v12 }
 0x7d2   :  { %904 = vmatpush.msra.mxu1 %v1664_v13 }
 0x7d4   :  { %905 = vmatpush.msra.mxu1 %v1670_v14 }
 0x7d5   :  { %v656_v50 = vpop.f32.mrf.mxu2 }
 0x7d6   :  { %906 = vmatpush.msra.mxu1 %v1676_v15  ;;  %v760_v15 = vmul.f32 %v1551_v43, %v757_v2  ;;  %v657_v51 = vadd.f32 %v1760_v39, %v656_v50 }
 0x7d8   :  { %907 = vmatpush.msra.mxu1 %v1686_v16 }
 0x7da   :  { %908 = vmatpush.msra.mxu1 %v1688_v17 }
 0x7dc   :  { %909 = vmatpush.msra.mxu1 %v1697_v20 }
 0x7de   :  { %910 = vmatpush.msra.mxu1 %v1703_v23 }
 0x83b   :  { %v557_v63 = vpop.f32.mrf.mxu1 }
 0x83c   :  { %v560_v6 = vadd.f32 %v557_v63, %v207_v44  ;;  %v531_v44 = vmul.f32 %v1551_v43, %v1820_v55 }
 0x83e   :  { %v561_v56 = vmul.f32 %v560_v6, %v1535_v26 }
 0x844   :  { %v783_v9 = vpop.f32.mrf.mxu1 }
 0x845   :  { %v786_v10 = vadd.f32 %v783_v9, %v651_v8 }
 0x847   :  { %v787_v11 = vmul.f32 %v786_v10, %v1535_v26 }
 0x849   :  { %1147 = vtanh.f32 %v787_v11 }
 0x84f   :  { %v1148_v12 = vpop.eup %1147 }
 0x850   :  { %v789_v13 = vmul.f32 %v1148_v12, %v1535_v26 }
 0x852   :  { %v790_v14 = vadd.f32 %v789_v13, %v1538_v31 }
 0x854   :  { %795 = vrot.lane.b32.xlu2 %v790_v14, %s1289_s3  ;;  %793 = vrot.lane.b32.xlu1 %v790_v14, %s1291_s14 }
 0x855   :  { %791 = vrot.lane.b32.xlu0 %v790_v14, %s1290_s13 }
 0x8ae   :  { %v796_v25 = vpop.permute.xlu2 %795 }
 0x8c6   :  { %v794_v22 = vpop.permute.xlu1 %793 }
 0x8c7   :  { %v799_v16 = vmul.f32 %v794_v22, %v790_v14  ;;  %v792_v17 = vpop.permute.xlu0 %791 }
 0x8c8   :  { %v798_v20 = vmul.f32 %v792_v17, %v760_v15 }
 0x8ca   :  { %v800_v23 = vadd.f32 %v799_v16, %v798_v20  ;;  %v659_v16 = vpop.f32.mrf.mxu2 }
 0x8cb   :  { %v660_v55 = vadd.f32 %v1760_v39, %v659_v16 }
 0x8cc   :  { %1149 = vtanh.f32 %v800_v23  ;;  %v803_v38 = vmul.f32 %v1551_v43, %v800_v23 }
 0x8d2   :  { %v1150_v24 = vpop.eup %1149 }
 0x8d3   :  { %v802_v27 = vmul.f32 %v1150_v24, %v796_v25 }
 0x8d5   :  { %v805_v28 = vmul.f32 %v1551_v43, %v802_v27 }
 0x8d7   :  { %825 = vmatmul.f32.vlgmr.msrb.gmra.mxu3 %v805_v28 }
 0x95a   :  { %v826_v32 = vpop.f32.mrf.mxu3 }
 0x95b   :  { %v829_v33 = vadd.f32 %v826_v32, %v654_v30 }
 0x95d   :  { %v830_v34 = vmul.f32 %v829_v33, %v1535_v26 }
 0x95f   :  { %1151 = vtanh.f32 %v830_v34 }
 0x965   :  { %v1152_v35 = vpop.eup %1151 }
 0x966   :  { %v832_v19 = vmul.f32 %v1152_v35, %v1535_v26 }
 0x968   :  { %v833_v36 = vadd.f32 %v832_v19, %v1538_v31 }
 0x96a   :  { %838 = vrot.lane.b32.xlu2 %v833_v36, %s1289_s3  ;;  %836 = vrot.lane.b32.xlu1 %v833_v36, %s1291_s14 }
 0x96b   :  { %834 = vrot.lane.b32.xlu0 %v833_v36, %s1290_s13 }
 0x9c4   :  { %v839_v47 = vpop.permute.xlu2 %838 }
 0x9dc   :  { %v837_v37 = vpop.permute.xlu1 %836 }
 0x9dd   :  { %v842_v40 = vmul.f32 %v837_v37, %v833_v36  ;;  %v835_v41 = vpop.permute.xlu0 %834 }
 0x9de   :  { %v841_v42 = vmul.f32 %v835_v41, %v803_v38  ;;  %v662_v38 = vpop.f32.mrf.mxu2 }
 0x9df   :  { %v663_v41 = vadd.f32 %v1760_v39, %v662_v38 }
 0x9e0   :  { %v843_v45 = vadd.f32 %v842_v40, %v841_v42 }
 0x9e2   :  { %1153 = vtanh.f32 %v843_v45  ;;  %v846_v2 = vmul.f32 %v1551_v43, %v843_v45 }
 0x9e8   :  { %v1154_v46 = vpop.eup %1153 }
 0x9e9   :  { %v845_v48 = vmul.f32 %v1154_v46, %v839_v47 }
 0x9eb   :  { %v848_v49 = vmul.f32 %v1551_v43, %v845_v48 }
 0x9ed   :  { %868 = vmatmul.f32.vlgmr.msrb.gmra.mxu0 %v848_v49 }
 0xa6a   :  { %v869_v52 = vpop.f32.mrf.mxu0 }
 0xa6b   :  { %v872_v53 = vadd.f32 %v869_v52, %v657_v51 }
 0xa6d   :  { %v873_v54 = vmul.f32 %v872_v53, %v1535_v26 }
 0xa6f   :  { %1155 = vtanh.f32 %v873_v54 }
 0xa70   :  { %1157 = vtanh.f32 %v561_v56 }
 0xa75   :  { %v1156_v57 = vpop.eup %1155 }
 0xa76   :  { %v875_v58 = vmul.f32 %v1156_v57, %v1535_v26  ;;  %v1158_v60 = vpop.eup %1157 }
 0xa77   :  { %v563_v62 = vmul.f32 %v1158_v60, %v1535_v26 }
 0xa78   :  { %v876_v59 = vadd.f32 %v875_v58, %v1538_v31 }
 0xa79   :  { %v564_v0 = vadd.f32 %v563_v62, %v1538_v31 }
 0xa7a   :  { %881 = vrot.lane.b32.xlu2 %v876_v59, %s1289_s3  ;;  %879 = vrot.lane.b32.xlu1 %v876_v59, %s1291_s14 }
 0xa7b   :  { %877 = vrot.lane.b32.xlu0 %v876_v59, %s1290_s13 }
 0xa82   :  { %567 = vrot.lane.b32.xlu1 %v564_v0, %s1291_s14 }
 0xa83   :  { %565 = vrot.lane.b32.xlu0 %v564_v0, %s1290_s13 }
 0xa8a   :  { %569 = vrot.lane.b32.xlu1 %v564_v0, %s1289_s3 }
 0xad4   :  { %v882_v9 = vpop.permute.xlu2 %881 }
 0xaec   :  { %v880_v1 = vpop.permute.xlu1 %879 }
 0xaed   :  { %v885_v61 = vmul.f32 %v880_v1, %v876_v59  ;;  %v878_v3 = vpop.permute.xlu0 %877 }
 0xaee   :  { %v884_v4 = vmul.f32 %v878_v3, %v846_v2 }
 0xaf0   :  { %v886_v5 = vadd.f32 %v885_v61, %v884_v4 }
 0xaf2   :  { %1159 = vtanh.f32 %v886_v5  ;;  %v889_v29 = vmul.f32 %v1551_v43, %v886_v5  ;;  %v1040_v5 = vld [vmem:[#allocation11 + $0x78] sm:$0xff] }
 0xaf3   :  { %1046 = vmatpush.msra.mxu0 %v1040_v5 }
 0xaf4   :  { %v568_v18 = vpop.permute.xlu1 %567 }
 0xaf5   :  { %v573_v63 = vmul.f32 %v568_v18, %v564_v0  ;;  %v566_v6 = vpop.permute.xlu0 %565  ;;  %v1039_v18 = vld [vmem:[#allocation11 + $0x70] sm:$0xff] }
 0xaf6   :  { %v572_v7 = vmul.f32 %v566_v6, %v531_v44  ;;  %1047 = vmatpush.msra.mxu0 %v1039_v18  ;;  %v1037_v44 = vld [vmem:[#allocation11 + $0x60] sm:$0xff]  ;;  %v1035_v6 = vld [vmem:[#allocation11 + $0x50] sm:$0xff] }
 0xaf8   :  { %v1160_v8 = vpop.eup %1159  ;;  %v574_v10 = vadd.f32 %v573_v63, %v572_v7  ;;  %v1036_v63 = vld [vmem:[#allocation11 + $0x58] sm:$0xff] }
 0xaf9   :  { %v888_v11 = vmul.f32 %v1160_v8, %v882_v9  ;;  %v1032_v7 = vld [vmem:[#allocation11 + $0x38] sm:$0xff]  ;;  %v1031_v8 = vld [vmem:[#allocation11 + $0x30] sm:$0xff]  ;;  %v1030_v9 = vld [vmem:[#allocation11 + $0x28] sm:$0xff] }
 0xafa   :  { %1161 = vtanh.f32 %v574_v10  ;;  %v1029_v10 = vld [vmem:[#allocation11 + $0x20] sm:$0xff] }
 0xafb   :  { %v891_v12 = vmul.f32 %v1551_v43, %v888_v11  ;;  %v1028_v11 = vld [vmem:[#allocation11 + $0x18] sm:$0xff] }
 0xafc   :  { %v570_v14 = vpop.permute.xlu1 %569 }
 0xafd   :  { %911 = vmatmul.f32.vlgmr.msra.gmra.mxu1 %v891_v12  ;;  %v1027_v12 = vld [vmem:[#allocation11 + $0x10] sm:$0xff] }
 0xb00   :  { %v1162_v13 = vpop.eup %1161 }
 0xb01   :  { %v576_v22 = vmul.f32 %v1162_v13, %v570_v14  ;;  %v1026_v13 = vld [vmem:[#allocation11 + $0x8] sm:$0xff]  ;;  %v1025_v14 = vld [vmem:[#allocation11] sm:$0xff] }
 0xb03   :  { %v579_v15 = vmul.f32 %v1551_v43, %v576_v22 }
 0xb05   :  { %664 = vmatmul.f32.gmra.mxu2 %v579_v15 }
 0xb7a   :  { %v912_v17 = vpop.f32.mrf.mxu1 }
 0xb7b   :  { %v915_v20 = vadd.f32 %v912_v17, %v660_v55 }
 0xb7d   :  { %v916_v23 = vmul.f32 %v915_v20, %v1535_v26 }
 0xb7f   :  { %1163 = vtanh.f32 %v916_v23 }
 0xb85   :  { %v1164_v24 = vpop.eup %1163 }
 0xb86   :  { %v918_v25 = vmul.f32 %v1164_v24, %v1535_v26 }
 0xb88   :  { %v919_v27 = vadd.f32 %v918_v25, %v1538_v31  ;;  %v665_v40 = vpop.f32.mrf.mxu2 }
 0xb89   :  { %v666_v62 = vadd.f32 %v1760_v39, %v665_v40  ;;  %v1038_v39 = vld [vmem:[#allocation11 + $0x68] sm:$0xff] }
 0xb8a   :  { %922 = vrot.lane.b32.xlu0 %v919_v27, %s1291_s14  ;;  %920 = vrot.lane.b32.xlu2 %v919_v27, %s1290_s13 }
 0xb8b   :  { %1048 = vmatpush.msra.mxu0 %v1038_v39 }
 0xb8d   :  { %1049 = vmatpush.msra.mxu0 %v1037_v44 }
 0xb8f   :  { %1050 = vmatpush.msra.mxu0 %v1036_v63 }
 0xb91   :  { %1051 = vmatpush.msra.mxu0 %v1035_v6 }
 0xb92   :  { %924 = vrot.lane.b32.xlu2 %v919_v27, %s1289_s3 }
 0xbe4   :  { %v921_v28 = vpop.permute.xlu2 %920 }
 0xbe5   :  { %v927_v32 = vmul.f32 %v921_v28, %v889_v29  ;;  %v1110_v28 = vld [vmem:[%s1922_s8] ss:$0 sm:$0xff] }
 0xbec   :  { %v925_v19 = vpop.permute.xlu2 %924 }
 0xbfc   :  { %v923_v30 = vpop.permute.xlu0 %922 }
 0xbfd   :  { %v928_v33 = vmul.f32 %v923_v30, %v919_v27 }
 0xbff   :  { %v929_v34 = vadd.f32 %v928_v33, %v927_v32 }
 0xc01   :  { %1165 = vtanh.f32 %v929_v34  ;;  %v932_v51 = vmul.f32 %v1551_v43, %v929_v34 }
 0xc07   :  { %v1166_v35 = vpop.eup %1165 }
 0xc08   :  { %v931_v36 = vmul.f32 %v1166_v35, %v925_v19 }
 0xc0a   :  { %v934_v37 = vmul.f32 %v1551_v43, %v931_v36 }
 0xc0c   :  { %954 = vmatmul.f32.vlgmr.msrb.gmra.mxu2 %v934_v37 }
 0xc8f   :  { %v955_v42 = vpop.f32.mrf.mxu2 }
 0xc90   :  { %v958_v45 = vadd.f32 %v955_v42, %v663_v41 }
 0xc92   :  { %v959_v46 = vmul.f32 %v958_v45, %v1535_v26 }
 0xc94   :  { %1167 = vtanh.f32 %v959_v46 }
 0xc9a   :  { %v1168_v47 = vpop.eup %1167 }
 0xc9b   :  { %v961_v48 = vmul.f32 %v1168_v47, %v1535_v26 }
 0xc9d   :  { %v962_v49 = vadd.f32 %v961_v48, %v1538_v31 }
 0xc9f   :  { %967 = vrot.lane.b32.xlu2 %v962_v49, %s1289_s3  ;;  %965 = vrot.lane.b32.xlu1 %v962_v49, %s1291_s14 }
 0xca0   :  { %963 = vrot.lane.b32.xlu0 %v962_v49, %s1290_s13 }
 0xcf9   :  { %v968_v58 = vpop.permute.xlu2 %967 }
 0xd11   :  { %v966_v50 = vpop.permute.xlu1 %965 }
 0xd12   :  { %v971_v52 = vmul.f32 %v966_v50, %v962_v49  ;;  %v964_v53 = vpop.permute.xlu0 %963 }
 0xd13   :  { %v970_v54 = vmul.f32 %v964_v53, %v932_v51 }
 0xd15   :  { %v972_v56 = vadd.f32 %v971_v52, %v970_v54 }
 0xd17   :  { %1169 = vtanh.f32 %v972_v56  ;;  %v975_v15 = vmul.f32 %v1551_v43, %v972_v56 }
 0xd1d   :  { %v1170_v57 = vpop.eup %1169 }
 0xd1e   :  { %v974_v59 = vmul.f32 %v1170_v57, %v968_v58 }
 0xd20   :  { %v977_v60 = vmul.f32 %v1551_v43, %v974_v59 }
 0xd22   :  { %997 = vmatmul.f32.vlgmr.msra.gmra.mxu3 %v977_v60 }
 0xda5   :  { %v998_v0 = vpop.f32.mrf.mxu3 }
 0xda6   :  { %v1001_v1 = vadd.f32 %v998_v0, %v666_v62 }
 0xda8   :  { %v1002_v2 = vmul.f32 %v1001_v1, %v1535_v26 }
 0xdaa   :  { %1171 = vtanh.f32 %v1002_v2 }
 0xdb0   :  { %v1172_v61 = vpop.eup %1171 }
 0xdb1   :  { %v1004_v3 = vmul.f32 %v1172_v61, %v1535_v26  ;;  %v1034_v26 = vld [vmem:[#allocation11 + $0x48] sm:$0xff] }
 0xdb2   :  { %1052 = vmatpush.msra.mxu0 %v1034_v26 }
 0xdb3   :  { %v1005_v4 = vadd.f32 %v1004_v3, %v1538_v31  ;;  %v1033_v31 = vld [vmem:[#allocation11 + $0x40] sm:$0xff] }
 0xdb4   :  { %1053 = vmatpush.msra.mxu0 %v1033_v31 }
 0xdb5   :  { %1010 = vrot.lane.b32.xlu2 %v1005_v4, %s1289_s3  ;;  %1008 = vrot.lane.b32.xlu1 %v1005_v4, %s1291_s14 }
 0xdb6   :  { %1006 = vrot.lane.b32.xlu0 %v1005_v4, %s1290_s13  ;;  %1054 = vmatpush.msra.mxu0 %v1032_v7 }
 0xdb8   :  { %1055 = vmatpush.msra.mxu0 %v1031_v8 }
 0xdba   :  { %1056 = vmatpush.msra.mxu0 %v1030_v9 }
 0xdbc   :  { %1057 = vmatpush.msra.mxu0 %v1029_v10 }
 0xdbe   :  { %1058 = vmatpush.msra.mxu0 %v1028_v11 }
 0xdc0   :  { %1059 = vmatpush.msra.mxu0 %v1027_v12 }
 0xdc2   :  { %1060 = vmatpush.msra.mxu0 %v1026_v13 }
 0xdc4   :  { %1061 = vmatpush.msra.mxu0 %v1025_v14 }
 0xe0f   :  { %v1011_v24 = vpop.permute.xlu2 %1010 }
 0xe27   :  { %v1009_v22 = vpop.permute.xlu1 %1008 }
 0xe28   :  { %v1014_v16 = vmul.f32 %v1009_v22, %v1005_v4  ;;  %v1007_v55 = vpop.permute.xlu0 %1006 }
 0xe29   :  { %v1013_v17 = vmul.f32 %v1007_v55, %v975_v15 }
 0xe2b   :  { %v1015_v20 = vadd.f32 %v1014_v16, %v1013_v17 }
 0xe2d   :  { %1173 = vtanh.f32 %v1015_v20 }
 0xe33   :  { %v1174_v23 = vpop.eup %1173 }
 0xe34   :  { %v1017_v25 = vmul.f32 %v1174_v23, %v1011_v24 }
 0xe36   :  { %v1020_v27 = vmul.f32 %v1551_v43, %v1017_v25 }
 0xe38   :  { %1062 = vmatmul.f32.vlgmr.msra.gmra.mxu0 %v1020_v27 }
 0xeb5   :  { %v1063_v29 = vpop.f32.mrf.mxu0 }
 0xeb6   :  { %v1064_v30 = vadd.f32 %v1110_v28, %v1063_v29 }
 0xeb8   :  { %v1067_v32 = vsel %vm1066_vm5, %v1064_v30, -1e+30 }
 0xeb9   :  { %1068 = vmax.xlane.f32.xlu0 %v1067_v32 }
 0xf2c   :  { %v1069_v33 = vpop.xlane.xlu0 %1068 }
 0xf2d   :  { %v1070_v34 = vsub.f32 %v1067_v32, %v1069_v33 }
 0xf2f   :  { %v1071_v35 = vmul.f32 1.442695, %v1070_v34 }
 0xf31   :  { %1175 = vpow2.f32 %v1071_v35 }
 0xf37   :  { %v1176_v19 = vpop.eup %1175 }
 0xf38   :  { %1073 = vadd.xlane.f32.xlu1 %v1176_v19 }
 0xfab   :  { %v1074_v36 = vpop.xlane.xlu1 %1073 }
 0xfac   :  { %1177 = vrcp.f32 %v1074_v36 }
 0xfb2   :  { %v1178_v43 = vpop.eup %1177 }
 0xfb3   :  { %v1076_v37 = vmul.f32 %v1178_v43, %v1074_v36 }
 0xfb5   :  { %v1077_v38 = vsub.f32 2.0, %v1076_v37 }
 0xfb7   :  { %v1078_v40 = vmul.f32 %v1178_v43, %v1077_v38 }
 0xfb9   :  { %v1079_v41 = vmul.f32 %v1176_v19, %v1078_v40 }
 0xfbb   :  { %1080 = vst [vmem:[%s1923_s9] sm:$0xff] %v1079_v41 }
 0xfbc   :  { %1085 = vsyncpa [#allocation7], 1 }
 0xfbd   :  { %1086 = vsyncpa [#allocation9], 1 }
 0xfbe   :  { %1087 = vsyncpa [#allocation12], 1 }

</bundles_post_ra>
